<compile_context>
chip_gen: v7x
topology: tpu7x:2x2x1
jax: 0.10.0
libtpu: 0.0.40
codegen_flags: <defaults>
</compile_context>

<pallas_src>
import functools

import numpy as np
import jax
import jax.numpy as jnp
from jax import lax
from jax.experimental import pallas as pl
from jax.experimental.pallas import tpu as pltpu


# ----------------------------------------------------------------------------
# Small synthetic config consistent with LiftSplat.__init__ / forward
# ----------------------------------------------------------------------------
DATA_CONF = dict(
    image_size=(64, 64),
    xbound=[-8.0, 8.0, 2.0],     # -> nx = 8
    ybound=[-8.0, 8.0, 2.0],     # -> ny = 8
    zbound=[-10.0, 10.0, 20.0],  # -> nz = 1
    dbound=[4.0, 12.0, 2.0],     # -> D  = 4
)
DOWNSAMPLE = 16
CAM_C = 128          # self.camC (reduced from 256 for the small demo)
B, N_CAM, C_IN = 2, 2, 3
C_PAD = 8            # padded input channels [r,g,b,1,0,0,0,0]; bias folded via the 1
CAM_TILE = 1024      # cam-encode pixel rows per grid step (step-overhead/DMA bound)
PIX_CHUNK = 256      # pixels per splat reduction step == matmul K (fills 256-wide MXU)
V_TILE = 128         # BEV voxel rows per resident output tile (256 on v6e/v7x at scale)


# ----------------------------------------------------------------------------
# Parameter / geometry helpers (glue, plain JAX)
# ----------------------------------------------------------------------------
def gen_dx_bx(xbound, ybound, zbound):
    dx = jnp.array([r[2] for r in (xbound, ybound, zbound)], jnp.float32)
    bx = jnp.array([r[0] + r[2] / 2.0 for r in (xbound, ybound, zbound)], jnp.float32)
    nx = tuple(int(round((r[1] - r[0]) / r[2])) for r in (xbound, ybound, zbound))
    return dx, bx, nx


def create_frustum(data_conf):
    ogfH, ogfW = data_conf['image_size']
    fH, fW = ogfH // DOWNSAMPLE, ogfW // DOWNSAMPLE
    ds = jnp.arange(*data_conf['dbound'], dtype=jnp.float32)
    D = ds.shape[0]
    ds = jnp.broadcast_to(ds.reshape(-1, 1, 1), (D, fH, fW))
    xs = jnp.broadcast_to(
        jnp.linspace(0.0, ogfW - 1, fW, dtype=jnp.float32).reshape(1, 1, fW), (D, fH, fW))
    ys = jnp.broadcast_to(
        jnp.linspace(0.0, ogfH - 1, fH, dtype=jnp.float32).reshape(1, fH, 1), (D, fH, fW))
    return jnp.stack([xs, ys, ds], axis=-1)          # (D, fH, fW, 3)


def get_geometry(frustum, rots, trans, intrins, post_rots, post_trans):
    """Returns B x N x D x fH x fW x 3 ego-frame points (same math as the module)."""
    points = frustum[None, None] - post_trans[:, :, None, None, None, :]
    inv_post = jnp.linalg.inv(post_rots)                               # (B,N,3,3)
    points = jnp.einsum('bnij,bndhwj->bndhwi', inv_post, points)
    points = jnp.concatenate(
        [points[..., :2] * points[..., 2:3], points[..., 2:3]], axis=-1)
    combine = jnp.einsum('bnij,bnjk->bnik', rots, jnp.linalg.inv(intrins))
    points = jnp.einsum('bnij,bndhwj->bndhwi', combine, points)
    points = points + trans[:, :, None, None, None, :]
    return points


# ----------------------------------------------------------------------------
# Pallas kernel 1: camera "lift" heads.
# Feature head retires straight to bf16 (P, camC); depth head produces
# lane-dense (D, P) softmax weights (EUP exp + approx reciprocal).
# ----------------------------------------------------------------------------
def _cam_encode_kernel(pix_ref, pixt_ref, wf_ref, wdt_ref, feat_ref, depth_ref, *, D):
    # Feature head: (TILE, C_PAD) @ (C_PAD, camC); retire immediately (low vreg life).
    feat_ref[...] = jnp.dot(pix_ref[...], wf_ref[...],
                            preferred_element_type=jnp.float32).astype(feat_ref.dtype)
    # Depth head, lane-dense: (8, C_PAD) @ (C_PAD, TILE); rows >= D are unused padding.
    logits = jnp.dot(wdt_ref[...], pixt_ref[...],
                     preferred_element_type=jnp.float32)[:D, :]
    m = jnp.max(logits, axis=0, keepdims=True)
    e = jnp.exp(logits - m)
    depth_ref[...] = e * pl.reciprocal(jnp.sum(e, axis=0, keepdims=True), approx=True)


def cam_encode_pallas(pix, pix_t, w_feat, w_depth_t, D):
    P = pix.shape[0]                                 # padded pixel count (mult of CAM_TILE)
    kernel = functools.partial(_cam_encode_kernel, D=D)
    feat, depth = pl.pallas_call(
        kernel,
        out_shape=(jax.ShapeDtypeStruct((P, CAM_C), jnp.bfloat16),
                   jax.ShapeDtypeStruct((D, P), jnp.float32)),
        grid_spec=pltpu.PrefetchScalarGridSpec(
            num_scalar_prefetch=0,
            grid=(P // CAM_TILE,),
            in_specs=[pl.BlockSpec((CAM_TILE, C_PAD), lambda i: (i, 0)),
                      pl.BlockSpec((C_PAD, CAM_TILE), lambda i: (0, i)),
                      pl.BlockSpec((C_PAD, CAM_C), lambda i: (0, 0)),
                      pl.BlockSpec((8, C_PAD), lambda i: (0, 0))],
            out_specs=[pl.BlockSpec((CAM_TILE, CAM_C), lambda i: (i, 0)),
                       pl.BlockSpec((D, CAM_TILE), lambda i: (0, i))]),
        compiler_params=pltpu.CompilerParams(dimension_semantics=("parallel",)),
    )(pix, pix_t, w_feat, w_depth_t)
    return feat, depth


# ----------------------------------------------------------------------------
# Pallas kernel 2: fused lift+splat.
# Equivalent to: depth (x) feat outer product -> bounds filter -> sort ->
# QuickCumsum -> scatter.  Here: W[v,p] = sum_d depth[d,p]*[idx[d,p]==v_off+v]
# (depth-weighted one-hot), then one bf16 MXU matmul W @ feat per pixel chunk,
# accumulated in f32 into the resident (V_TILE, C) output block.
# ----------------------------------------------------------------------------
def _splat_kernel(idx_ref, dep_ref, feat_ref, out_ref, *, D, v_tile, chunk):
    k = pl.program_id(1)

    @pl.when(k == 0)
    def _():
        out_ref[...] = jnp.zeros_like(out_ref)

    # idx == -1 (dropped / padded point) never matches any voxel row.
    v_off = pl.program_id(0) * v_tile
    rel = idx_ref[...] - v_off                                    # (D, chunk), tiny
    vox = lax.broadcasted_iota(jnp.int32, (v_tile, chunk), 0)     # step-invariant
    dep = dep_ref[...].astype(jnp.bfloat16)                       # (D, chunk)
    w = jnp.zeros((v_tile, chunk), jnp.bfloat16)
    for d in range(D):                        # D is tiny & static -> unrolled
        w = w + jnp.where(rel[d:d + 1, :] == vox, dep[d:d + 1, :], 0.0)
    # bf16 MXU matmul, f32 accumulation directly into the resident output block.
    out_ref[...] += jnp.dot(w, feat_ref[...], preferred_element_type=jnp.float32)


def splat_pallas(flat_idx, depth, feat, v_pad):
    # flat_idx: (D, P) int32 flat voxel id per (depth bin, pixel), -1 = dropped
    # depth   : (D, P) f32 softmax depth weights (lane-dense from cam-encode)
    # feat    : (P, C) bf16 per-pixel features
    D, P = flat_idx.shape
    C = feat.shape[1]
    kernel = functools.partial(_splat_kernel, D=D, v_tile=V_TILE, chunk=PIX_CHUNK)
    # TODO(synk): feat BlockSpec can get pipeline_mode=pl.Buffered(3) at production
    # sizes if the per-step compute is shorter than the feat DMA (check v7x VMEM).
    return pl.pallas_call(
        kernel,
        out_shape=jax.ShapeDtypeStruct((v_pad, C), jnp.float32),
        grid_spec=pltpu.PrefetchScalarGridSpec(
            num_scalar_prefetch=0,
            grid=(v_pad // V_TILE, P // PIX_CHUNK),      # (parallel, reduction last)
            in_specs=[pl.BlockSpec((D, PIX_CHUNK), lambda v, k: (0, k)),
                      pl.BlockSpec((D, PIX_CHUNK), lambda v, k: (0, k)),
                      pl.BlockSpec((PIX_CHUNK, C), lambda v, k: (k, 0))],
            out_specs=pl.BlockSpec((V_TILE, C), lambda v, k: (v, 0))),
        compiler_params=pltpu.CompilerParams(
            dimension_semantics=("parallel", "arbitrary")),
    )(flat_idx, depth, feat)


# ----------------------------------------------------------------------------
# LiftSplat forward (glue around the two kernels)
# ----------------------------------------------------------------------------
def lift_splat_forward(params, x, trans, rots, intrins, post_trans, post_rots):
    frustum, dx, bx, nx = params['frustum'], params['dx'], params['bx'], params['nx']
    D, fH, fW, _ = frustum.shape
    nx0, nx1, nx2 = nx
    Bb, Nn, C, imH, imW = x.shape

    # --- pixel features: 16x avg-pool stand-in backbone, padded K=8 + bias channel ---
    xp = x.reshape(Bb * Nn, C, fH, DOWNSAMPLE, fW, DOWNSAMPLE).mean(axis=(3, 5))
    pix3 = xp.transpose(0, 2, 3, 1).reshape(Bb * Nn * fH * fW, C)
    npix = pix3.shape[0]
    npad = ((npix + CAM_TILE - 1) // CAM_TILE) * CAM_TILE   # mult of CAM_TILE & PIX_CHUNK
    pix = jnp.zeros((npad, C_PAD), jnp.float32)
    pix = pix.at[:npix, :C].set(pix3).at[:npix, C].set(1.0)  # constant-1 bias channel
    pix_t = pix.T                                            # tiny (C_PAD, npad) relayout

    # --- lift heads: bf16 feat (P, camC) + lane-dense softmax depth (D, P) ---
    feat, depth = cam_encode_pallas(pix, pix_t, params['w_feat'], params['w_depth_t'], D)

    # --- geometry -> flat voxel ids in (D, pixel) order (no feature transpose) ---
    geom = get_geometry(frustum, rots, trans, intrins, post_rots, post_trans)
    gi = ((geom - (bx - dx / 2.0)) / dx).astype(jnp.int32)     # (B,N,D,fH,fW,3)
    gx, gy, gz = gi[..., 0], gi[..., 1], gi[..., 2]
    kept = (gx >= 0) & (gx < nx0) & (gy >= 0) & (gy < nx1) & (gz >= 0) & (gz < nx2)
    b_ix = jnp.arange(Bb, dtype=jnp.int32).reshape(Bb, 1, 1, 1, 1)
    flat = ((b_ix * nx2 + gz) * nx1 + gy) * nx0 + gx
    flat = jnp.where(kept, flat, -1).astype(jnp.int32)          # -1 = dropped point
    flat = flat.transpose(2, 0, 1, 3, 4).reshape(D, npix)       # (D, B*N*fH*fW)
    flat = jnp.pad(flat, ((0, 0), (0, npad - npix)), constant_values=-1)

    # --- splat: depth-weighted one-hot segment-sum over V-tiles ---
    V = Bb * nx2 * nx1 * nx0
    v_pad = ((V + V_TILE - 1) // V_TILE) * V_TILE
    pooled = splat_pallas(flat, depth, feat, v_pad)[:V]         # (V, camC) f32

    final = pooled.reshape(Bb, nx2, nx1, nx0, CAM_C).transpose(0, 1, 4, 2, 3)
    final = final.reshape(Bb, nx2 * CAM_C, nx1, nx0)  # == torch.cat(final.unbind(2), 1)
    # TODO(synk): BevEncode / InstaGraM heads are external modules not provided with
    # LiftSplat; the lift-splat BEV feature map (B, camC*nz, ny, nx) is returned.
    return final


# ----------------------------------------------------------------------------
# Pure-JAX reference (mirrors the PyTorch semantics) for a correctness check
# ----------------------------------------------------------------------------
def reference_forward(params, x, trans, rots, intrins, post_trans, post_rots):
    frustum, dx, bx, nx = params['frustum'], params['dx'], params['bx'], params['nx']
    D, fH, fW, _ = frustum.shape
    geom = get_geometry(frustum, rots, trans, intrins, post_rots, post_trans)

    Bb, Nn, C, imH, imW = x.shape
    xi = x.reshape(Bb * Nn, C, fH, DOWNSAMPLE, fW, DOWNSAMPLE).mean(axis=(3, 5))
    pix = xi.transpose(0, 2, 3, 1).reshape(-1, C)
    logits = pix @ params['wd'] + params['bd']
    featp = pix @ params['wf'] + params['bf']
    depth = jax.nn.softmax(logits, axis=-1)
    out = depth[:, :, None] * featp[:, None, :]                     # (P, D, camC)
    feats = out.reshape(Bb, Nn, fH, fW, D, CAM_C).transpose(0, 1, 4, 2, 3, 5)

    nx0, nx1, nx2 = nx
    Nprime = Bb * Nn * D * fH * fW
    f = feats.reshape(Nprime, CAM_C)
    gi = ((geom - (bx - dx / 2.0)) / dx).astype(jnp.int32).reshape(Nprime, 3)
    batch_ix = jnp.repeat(jnp.arange(Bb, dtype=jnp.int32), Nprime // Bb)
    gx, gy, gz = gi[:, 0], gi[:, 1], gi[:, 2]
    kept = (gx >= 0) & (gx < nx0) & (gy >= 0) & (gy < nx1) & (gz >= 0) & (gz < nx2)
    flat = jnp.where(kept, ((batch_ix * nx2 + gz) * nx1 + gy) * nx0 + gx, 0)
    f = f * kept[:, None].astype(f.dtype)
    V = Bb * nx2 * nx1 * nx0
    pooled = jnp.zeros((V, CAM_C), jnp.float32).at[flat].add(f)
    final = pooled.reshape(Bb, nx2, nx1, nx0, CAM_C).transpose(0, 1, 4, 2, 3)
    return final.reshape(Bb, nx2 * CAM_C, nx1, nx0)


# ----------------------------------------------------------------------------
if __name__ == "__main__":
    key = jax.random.PRNGKey(0)
    k1, k2, k3, k4 = jax.random.split(key, 4)

    frustum = create_frustum(DATA_CONF)
    D, fH, fW, _ = frustum.shape
    dx, bx, nx = gen_dx_bx(DATA_CONF['xbound'], DATA_CONF['ybound'], DATA_CONF['zbound'])

    wd = (0.1 * jax.random.normal(k1, (C_IN, D))).astype(jnp.float32)
    bd = jnp.zeros((1, D), jnp.float32)
    wf = (0.1 * jax.random.normal(k2, (C_IN, CAM_C))).astype(jnp.float32)
    bf = jnp.zeros((1, CAM_C), jnp.float32)

    # Feature weight with K zero-padded to 8; row C_IN carries the bias (constant-1
    # input channel), so the matmul is exactly pix @ wf + bf.
    w_feat = jnp.zeros((C_PAD, CAM_C), jnp.float32)
    w_feat = w_feat.at[:C_IN, :].set(wf).at[C_IN, :].set(bf[0])
    # Depth weight, transposed for the lane-dense (D, P) head; rows >= D are unused.
    w_depth_t = jnp.zeros((8, C_PAD), jnp.float32)
    w_depth_t = w_depth_t.at[:D, :C_IN].set(wd.T).at[:D, C_IN].set(bd[0])

    params = dict(frustum=frustum, dx=dx, bx=bx, nx=nx,
                  wd=wd, bd=bd, wf=wf, bf=bf,
                  w_feat=w_feat, w_depth_t=w_depth_t)

    imH, imW = DATA_CONF['image_size']
    x = jax.random.normal(k3, (B, N_CAM, C_IN, imH, imW), jnp.float32)
    trans = 0.1 * jax.random.normal(k4, (B, N_CAM, 3)).astype(jnp.float32)
    rots = jnp.broadcast_to(jnp.eye(3, dtype=jnp.float32), (B, N_CAM, 3, 3))
    intrins = jnp.broadcast_to(
        jnp.array([[32.0, 0.0, 32.0], [0.0, 32.0, 32.0], [0.0, 0.0, 1.0]], jnp.float32),
        (B, N_CAM, 3, 3))
    post_rots = jnp.broadcast_to(jnp.eye(3, dtype=jnp.float32), (B, N_CAM, 3, 3))
    post_trans = jnp.zeros((B, N_CAM, 3), jnp.float32)

    bev = lift_splat_forward(params, x, trans, rots, intrins, post_trans, post_rots)
    bev = jax.block_until_ready(bev)

    ref = jax.block_until_ready(
        reference_forward(params, x, trans, rots, intrins, post_trans, post_rots))

    assert bev.shape == (B, CAM_C * nx[2], nx[1], nx[0]), bev.shape
    # NOTE: depth weights use bf16 W / bf16 feat / EUP approx reciprocal -> ~1% element
    # error bound vs the pure-f32 reference (f32 accumulation kept throughout).
    np.testing.assert_allclose(np.asarray(bev), np.asarray(ref), rtol=2e-2, atol=2e-2)
    print("KERNEL_OK")
</pallas_src>

<mosaic_0001>
module attributes {stable_mosaic.version = 11 : i64} {
  func.func @_cam_encode_kernel(%arg0: i32, %arg1: memref<1024x8xf32, #tpu.memory_space<vmem>>, %arg2: memref<8x1024xf32, #tpu.memory_space<vmem>>, %arg3: memref<8x128xf32, #tpu.memory_space<vmem>>, %arg4: memref<8x8xf32, #tpu.memory_space<vmem>>, %arg5: memref<1024x128xbf16, #tpu.memory_space<vmem>>, %arg6: memref<4x1024xf32, #tpu.memory_space<vmem>>) attributes {dimension_semantics = [#tpu.dimension_semantics<parallel>], iteration_bounds = array<i64: 1>, scalar_prefetch = 0 : i64, scratch_operands = 0 : i64, tpu.core_type = #tpu.core_type<tc>, window_params = [{transform_indices = @transform_0, window_bounds = array<i64: 1024, 8>}, {transform_indices = @transform_1, window_bounds = array<i64: 8, 1024>}, {pipeline_mode = #tpu.pipeline_mode<synchronous>, transform_indices = @transform_2, window_bounds = array<i64: 8, 128>}, {pipeline_mode = #tpu.pipeline_mode<synchronous>, transform_indices = @transform_3, window_bounds = array<i64: 8, 8>}, {transform_indices = @transform_4, window_bounds = array<i64: 1024, 128>}, {transform_indices = @transform_5, window_bounds = array<i64: 4, 1024>}]} {
    %c0 = arith.constant 0 : index
    %c0_0 = arith.constant 0 : index
    %0 = vector.load %arg1[%c0, %c0_0] : memref<1024x8xf32, #tpu.memory_space<vmem>>, vector<1024x8xf32>
    %c0_1 = arith.constant 0 : index
    %c0_2 = arith.constant 0 : index
    %1 = vector.load %arg3[%c0_1, %c0_2] : memref<8x128xf32, #tpu.memory_space<vmem>>, vector<8x128xf32>
    %cst = arith.constant dense<0.000000e+00> : vector<1024x128xf32>
    %2 = tpu.matmul %0, %1, %cst {dimension_numbers = #tpu.dot_dimension_numbers<[1], [0], [0], [1], [0, 0, 1, 1], [], []>} : vector<1024x8xf32>, vector<8x128xf32>, vector<1024x128xf32> -> vector<1024x128xf32>
    %3 = arith.truncf %2 : vector<1024x128xf32> to vector<1024x128xbf16>
    %c0_3 = arith.constant 0 : index
    %c0_4 = arith.constant 0 : index
    %4 = vector.load %arg5[%c0_3, %c0_4] : memref<1024x128xbf16, #tpu.memory_space<vmem>>, vector<1024x128xbf16>
    tpu.vector_store %arg5[%c0_3, %c0_4], %3 {strides = array<i32>} : memref<1024x128xbf16, #tpu.memory_space<vmem>>, vector<1024x128xbf16>,
    %c0_5 = arith.constant 0 : index
    %c0_6 = arith.constant 0 : index
    %5 = vector.load %arg4[%c0_5, %c0_6] : memref<8x8xf32, #tpu.memory_space<vmem>>, vector<8x8xf32>
    %c0_7 = arith.constant 0 : index
    %c0_8 = arith.constant 0 : index
    %6 = vector.load %arg2[%c0_7, %c0_8] : memref<8x1024xf32, #tpu.memory_space<vmem>>, vector<8x1024xf32>
    %cst_9 = arith.constant dense<0.000000e+00> : vector<8x1024xf32>
    %7 = tpu.matmul %5, %6, %cst_9 {dimension_numbers = #tpu.dot_dimension_numbers<[1], [0], [0], [1], [0, 0, 1, 1], [], []>} : vector<8x8xf32>, vector<8x1024xf32>, vector<8x1024xf32> -> vector<8x1024xf32>
    %8 = vector.extract_strided_slice %7 {offsets = [0, 0], sizes = [4, 1024], strides = [1, 1]} : vector<8x1024xf32> to vector<4x1024xf32>
    %cst_10 = arith.constant dense<0xFF800000> : vector<1024xf32>
    %9 = vector.multi_reduction <maximumf>, %8, %cst_10 [0] : vector<4x1024xf32> to vector<1024xf32>
    %10 = vector.shape_cast %9 : vector<1024xf32> to vector<1x1024xf32>
    %11 = vector.broadcast %10 : vector<1x1024xf32> to vector<4x1024xf32>
    %12 = arith.subf %8, %11 : vector<4x1024xf32>
    %13 = math.exp %12 : vector<4x1024xf32>
    %cst_11 = arith.constant dense<0.000000e+00> : vector<1024xf32>
    %14 = vector.multi_reduction <add>, %13, %cst_11 [0] : vector<4x1024xf32> to vector<1024xf32>
    %15 = vector.shape_cast %14 : vector<1024xf32> to vector<1x1024xf32>
    %16 = tpu.reciprocal %15 {approx = true} : vector<1x1024xf32> -> vector<1x1024xf32>
    %17 = vector.broadcast %16 : vector<1x1024xf32> to vector<4x1024xf32>
    %18 = arith.mulf %13, %17 : vector<4x1024xf32>
    %c0_12 = arith.constant 0 : index
    %c0_13 = arith.constant 0 : index
    %19 = vector.load %arg6[%c0_12, %c0_13] : memref<4x1024xf32, #tpu.memory_space<vmem>>, vector<4x1024xf32>
    tpu.vector_store %arg6[%c0_12, %c0_13], %18 {strides = array<i32>} : memref<4x1024xf32, #tpu.memory_space<vmem>>, vector<4x1024xf32>,
    return
  }
  func.func @transform_0(%arg0: i32) -> (i32, i32) {
    %c0_i32 = arith.constant 0 : i32
    %c0_i32_0 = arith.constant 0 : i32
    return %arg0, %c0_i32 : i32, i32
  }
  func.func @transform_1(%arg0: i32) -> (i32, i32) {
    %c0_i32 = arith.constant 0 : i32
    %c0_i32_0 = arith.constant 0 : i32
    return %c0_i32, %arg0 : i32, i32
  }
  func.func @transform_2(%arg0: i32) -> (i32, i32) {
    %c0_i32 = arith.constant 0 : i32
    %c0_i32_0 = arith.constant 0 : i32
    %c0_i32_1 = arith.constant 0 : i32
    return %c0_i32, %c0_i32_0 : i32, i32
  }
  func.func @transform_3(%arg0: i32) -> (i32, i32) {
    %c0_i32 = arith.constant 0 : i32
    %c0_i32_0 = arith.constant 0 : i32
    %c0_i32_1 = arith.constant 0 : i32
    return %c0_i32, %c0_i32_0 : i32, i32
  }
  func.func @transform_4(%arg0: i32) -> (i32, i32) {
    %c0_i32 = arith.constant 0 : i32
    %c0_i32_0 = arith.constant 0 : i32
    return %arg0, %c0_i32 : i32, i32
  }
  func.func @transform_5(%arg0: i32) -> (i32, i32) {
    %c0_i32 = arith.constant 0 : i32
    %c0_i32_0 = arith.constant 0 : i32
    return %c0_i32, %arg0 : i32, i32
  }
}

</mosaic_0001>

<bundles_post_ra>
// kernel: tpu_custom_call.1
= control target key start
LH: loop header
LB: loop body
LE: loop exit
PB: predicated region body
PF: predicated region fallthrough
CT: control target
= control target key end

     0   :  { %11 = vsyncpa [#allocation3], 0  ;;  %vm150_vm0 = vcmask 64512   ;;  %s4233_s0 = inlined_call_operand.vmem [shape: f32[1024,8], index: 0, kind: input, shape index: {}]   ;;  %s4234_s1 = inlined_call_operand.vmem [shape: f32[8,1024], index: 1, kind: input, shape index: {}]   ;;  %s4235_s2 = inlined_call_operand.vmem [shape: f32[8,128], index: 2, kind: input, shape index: {}]   ;;  %s4236_s3 = inlined_call_operand.vmem [shape: f32[8,8], index: 3, kind: input, shape index: {}]   ;;  %s4237_s4 = inlined_call_operand.hbm [shape: bf16[1024,128], index: 4, kind: output, shape index: {0}]   ;;  %s4238_s5 = inlined_call_operand.hbm [shape: f32[4,1024], index: 5, kind: output, shape index: {1}]  }
   0x1   :  { %v149_v0 = vld [vmem:[%s4235_s2] sm:$0xff]  ;;  %v90_v2 = vld [vmem:[%s4233_s0 + $0x228] sm:$0xff]  ;;  %v91_v5 = vld [vmem:[%s4233_s0 + $0x230] sm:$0xff] }
   0x2   :  { %v89_v1 = vld [vmem:[%s4233_s0 + $0x220] sm:$0xff]  ;;  %3473 = vmatprep.subr.mxu1 %v149_v0  ;;  %v1882_v3 = vld [vmem:[%s4234_s1 + $0x8] sm:$0xff]  ;;  %3279 = vmatprep.subr.mxu0 %v149_v0  ;;  %v92_v6 = vld [vmem:[%s4233_s0 + $0x238] sm:$0xff] }
   0x3   :  { %3383 = vmatprep.mubr.msk.f32.mxu1 %vm150_vm0, %v89_v1  ;;  %v1881_v4 = vld [vmem:[%s4234_s1] sm:$0xff]  ;;  %3474 = vmatpush3.msra.mxu1 %v149_v0  ;;  %v94_v8 = vld [vmem:[%s4233_s0 + $0x248] sm:$0xff]  ;;  %v95_v9 = vld [vmem:[%s4233_s0 + $0x250] sm:$0xff] }
   0x4   :  { %3384 = vmatmul.mubr.msk.f32.vlgmr.msra.gmra.mrb[0].mxu1 %vm150_vm0, %v90_v2  ;;  %1892 = vmatprep.subr.mxu1 %v1882_v3  ;;  %v93_v7 = vld [vmem:[%s4233_s0 + $0x240] sm:$0xff]  ;;  %v22_v11 = vld [vmem:[%s4233_s0 + $0x8] sm:$0xff]  ;;  %v23_v12 = vld [vmem:[%s4233_s0 + $0x10] sm:$0xff] }
   0x5   :  { %1893 = vmatpush1.msra.mxu1 %v1881_v4  ;;  %3386 = vmatprep.mubr.msk.f32.mxu1 %vm150_vm0, %v91_v5  ;;  %v21_v10 = vld [vmem:[%s4233_s0] sm:$0xff]  ;;  %v96_v13 = vld [vmem:[%s4233_s0 + $0x258] sm:$0xff]  ;;  %v98_v17 = vld [vmem:[%s4233_s0 + $0x268] sm:$0xff] }
   0x6   :  { %3280 = vmatpush3.msra.mxu0 %v149_v0  ;;  %3281 = vmatprep.mubr.msk.f32.mxu0 %vm150_vm0, %v21_v10  ;;  %v97_v14 = vld [vmem:[%s4233_s0 + $0x260] sm:$0xff]  ;;  %v24_v15 = vld [vmem:[%s4233_s0 + $0x18] sm:$0xff]  ;;  %v99_v18 = vld [vmem:[%s4233_s0 + $0x270] sm:$0xff] }
   0x7   :  { %3282 = vmatmul.mubr.msk.f32.vlgmr.msra.gmra.mrb[0].mxu0 %vm150_vm0, %v22_v11  ;;  %v25_v16 = vld [vmem:[%s4233_s0 + $0x20] sm:$0xff]  ;;  %v26_v19 = vld [vmem:[%s4233_s0 + $0x28] sm:$0xff]  ;;  %v27_v20 = vld [vmem:[%s4233_s0 + $0x30] sm:$0xff] }
   0x8   :  { %3387 = vmatmul.mubr.msk.f32.gmra.mrb[2].mxu1 %vm150_vm0, %v92_v6  ;;  %3284 = vmatprep.mubr.msk.f32.mxu0 %vm150_vm0, %v23_v12  ;;  %v100_v21 = vld [vmem:[%s4233_s0 + $0x278] sm:$0xff]  ;;  %v101_v22 = vld [vmem:[%s4233_s0 + $0x280] sm:$0xff]  ;;  %v102_v25 = vld [vmem:[%s4233_s0 + $0x288] sm:$0xff] }
   0x9   :  { %3389 = vmatprep.mubr.msk.f32.mxu1 %vm150_vm0, %v93_v7  ;;  %v28_v23 = vld [vmem:[%s4233_s0 + $0x38] sm:$0xff]  ;;  %v29_v24 = vld [vmem:[%s4233_s0 + $0x40] sm:$0xff]  ;;  %v103_v26 = vld [vmem:[%s4233_s0 + $0x290] sm:$0xff] }
   0xa   :  { %v30_v27 = vld [vmem:[%s4233_s0 + $0x48] sm:$0xff]  ;;  %v31_v28 = vld [vmem:[%s4233_s0 + $0x50] sm:$0xff]  ;;  %v104_v29 = vld [vmem:[%s4233_s0 + $0x298] sm:$0xff] }
   0xb   :  { %3285 = vmatmul.mubr.msk.f32.gmra.mrb[2].mxu0 %vm150_vm0, %v24_v15  ;;  %v105_v30 = vld [vmem:[%s4233_s0 + $0x2a0] sm:$0xff]  ;;  %v32_v31 = vld [vmem:[%s4233_s0 + $0x58] sm:$0xff]  ;;  %v106_v33 = vld [vmem:[%s4233_s0 + $0x2a8] sm:$0xff] }
   0xc   :  { %3390 = vmatmul.mubr.msk.f32.gmra.mrb[4].mxu1 %vm150_vm0, %v94_v8  ;;  %3287 = vmatprep.mubr.msk.f32.mxu0 %vm150_vm0, %v25_v16  ;;  %v33_v32 = vld [vmem:[%s4233_s0 + $0x60] sm:$0xff]  ;;  %v1884_v34 = vld [vmem:[%s4234_s1 + $0x18] sm:$0xff]  ;;  %v107_v35 = vld [vmem:[%s4233_s0 + $0x2b0] sm:$0xff] }
   0xd   :  { %3392 = vmatprep.mubr.msk.f32.mxu1 %vm150_vm0, %v95_v9  ;;  %v34_v36 = vld [vmem:[%s4233_s0 + $0x68] sm:$0xff]  ;;  %1963 = vmatprep.subr.mxu1 %v1884_v34  ;;  %v35_v37 = vld [vmem:[%s4233_s0 + $0x70] sm:$0xff]  ;;  %v108_v38 = vld [vmem:[%s4233_s0 + $0x2b8] sm:$0xff] }
   0xe   :  { %v109_v39 = vld [vmem:[%s4233_s0 + $0x2c0] sm:$0xff]  ;;  %v36_v40 = vld [vmem:[%s4233_s0 + $0x78] sm:$0xff]  ;;  %v110_v42 = vld [vmem:[%s4233_s0 + $0x2c8] sm:$0xff] }
   0xf   :  { %3288 = vmatmul.mubr.msk.f32.gmra.mrb[4].mxu0 %vm150_vm0, %v26_v19  ;;  %v37_v41 = vld [vmem:[%s4233_s0 + $0x80] sm:$0xff]  ;;  %v111_v43 = vld [vmem:[%s4233_s0 + $0x2d0] sm:$0xff]  ;;  %v38_v44 = vld [vmem:[%s4233_s0 + $0x88] sm:$0xff] }
  0x10   :  { %3393 = vmatmul.mubr.msk.f32.gmra.mrb[6].mxu1 %vm150_vm0, %v96_v13  ;;  %3290 = vmatprep.mubr.msk.f32.mxu0 %vm150_vm0, %v27_v20  ;;  %v39_v45 = vld [vmem:[%s4233_s0 + $0x90] sm:$0xff]  ;;  %v112_v46 = vld [vmem:[%s4233_s0 + $0x2d8] sm:$0xff]  ;;  %v113_v47 = vld [vmem:[%s4233_s0 + $0x2e0] sm:$0xff] }
  0x11   :  { %3395 = vmatprep.mubr.msk.f32.mxu1 %vm150_vm0, %v97_v14  ;;  %v40_v48 = vld [vmem:[%s4233_s0 + $0x98] sm:$0xff]  ;;  %v41_v49 = vld [vmem:[%s4233_s0 + $0xa0] sm:$0xff] }
  0x13   :  { %3291 = vmatmul.mubr.msk.f32.gmra.mrb[6].mxu0 %vm150_vm0, %v28_v23 }
  0x14   :  { %3396 = vmatmul.mubr.msk.f32.gmra.mrb[8].mxu1 %vm150_vm0, %v98_v17  ;;  %3293 = vmatprep.mubr.msk.f32.mxu0 %vm150_vm0, %v29_v24 }
  0x15   :  { %3398 = vmatprep.mubr.msk.f32.mxu1 %vm150_vm0, %v99_v18 }
  0x17   :  { %3294 = vmatmul.mubr.msk.f32.gmra.mrb[8].mxu0 %vm150_vm0, %v30_v27 }
  0x18   :  { %3399 = vmatmul.mubr.msk.f32.gmra.mrb[10].mxu1 %vm150_vm0, %v100_v21  ;;  %3296 = vmatprep.mubr.msk.f32.mxu0 %vm150_vm0, %v31_v28 }
  0x19   :  { %3401 = vmatprep.mubr.msk.f32.mxu1 %vm150_vm0, %v101_v22 }
  0x1b   :  { %3297 = vmatmul.mubr.msk.f32.gmra.mrb[10].mxu0 %vm150_vm0, %v32_v31 }
  0x1c   :  { %3402 = vmatmul.mubr.msk.f32.gmra.mrb[12].mxu1 %vm150_vm0, %v102_v25  ;;  %3299 = vmatprep.mubr.msk.f32.mxu0 %vm150_vm0, %v33_v32 }
  0x1d   :  { %3404 = vmatprep.mubr.msk.f32.mxu1 %vm150_vm0, %v103_v26 }
  0x1f   :  { %3300 = vmatmul.mubr.msk.f32.gmra.mrb[12].mxu0 %vm150_vm0, %v34_v36 }
  0x20   :  { %3405 = vmatmul.mubr.msk.f32.gmra.mrb[14].mxu1 %vm150_vm0, %v104_v29  ;;  %3302 = vmatprep.mubr.msk.f32.mxu0 %vm150_vm0, %v35_v37 }
  0x21   :  { %3407 = vmatprep.mubr.msk.f32.mxu1 %vm150_vm0, %v105_v30 }
  0x23   :  { %3303 = vmatmul.mubr.msk.f32.gmra.mrb[14].mxu0 %vm150_vm0, %v36_v40 }
  0x24   :  { %3408 = vmatmul.mubr.msk.f32.gmra.mrb[16].mxu1 %vm150_vm0, %v106_v33  ;;  %3305 = vmatprep.mubr.msk.f32.mxu0 %vm150_vm0, %v37_v41 }
  0x25   :  { %3410 = vmatprep.mubr.msk.f32.mxu1 %vm150_vm0, %v107_v35 }
  0x27   :  { %3306 = vmatmul.mubr.msk.f32.gmra.mrb[16].mxu0 %vm150_vm0, %v38_v44 }
  0x28   :  { %3411 = vmatmul.mubr.msk.f32.gmra.mrb[18].mxu1 %vm150_vm0, %v108_v38  ;;  %3308 = vmatprep.mubr.msk.f32.mxu0 %vm150_vm0, %v39_v45 }
  0x29   :  { %3413 = vmatprep.mubr.msk.f32.mxu1 %vm150_vm0, %v109_v39 }
  0x2c   :  { %3414 = vmatmul.mubr.msk.f32.gmra.mrb[20].mxu1 %vm150_vm0, %v110_v42 }
  0x2d   :  { %3416 = vmatprep.mubr.msk.f32.mxu1 %vm150_vm0, %v111_v43 }
  0x2e   :  { %12 = vsyncpa [#allocation5], 0  ;;  %v114_v50 = vld [vmem:[%s4233_s0 + $0x2e8] sm:$0xff]  ;;  %3309 = vmatmul.mubr.msk.f32.gmra.mrb[18].mxu0 %vm150_vm0, %v40_v48  ;;  %v115_v51 = vld [vmem:[%s4233_s0 + $0x2f0] sm:$0xff]  ;;  %vm2176_vm1 = vcmask 1043456  }
  0x2f   :  { %3311 = vmatprep.mubr.msk.f32.mxu0 %vm150_vm0, %v41_v49  ;;  %v42_v52 = vld [vmem:[%s4233_s0 + $0xa8] sm:$0xff]  ;;  %v43_v53 = vld [vmem:[%s4233_s0 + $0xb0] sm:$0xff]  ;;  %v116_v54 = vld [vmem:[%s4233_s0 + $0x2f8] sm:$0xff] }
  0x30   :  { %3417 = vmatmul.mubr.msk.f32.gmra.mrb[22].mxu1 %vm150_vm0, %v112_v46  ;;  %v117_v55 = vld [vmem:[%s4233_s0 + $0x300] sm:$0xff]  ;;  %v44_v56 = vld [vmem:[%s4233_s0 + $0xb8] sm:$0xff]  ;;  %v118_v58 = vld [vmem:[%s4233_s0 + $0x308] sm:$0xff] }
  0x31   :  { %3419 = vmatprep.mubr.msk.f32.mxu1 %vm150_vm0, %v113_v47  ;;  %v45_v57 = vld [vmem:[%s4233_s0 + $0xc0] sm:$0xff]  ;;  %v119_v59 = vld [vmem:[%s4233_s0 + $0x310] sm:$0xff]  ;;  %v46_v60 = vld [vmem:[%s4233_s0 + $0xc8] sm:$0xff] }
  0x32   :  { %3312 = vmatmul.mubr.msk.f32.gmra.mrb[20].mxu0 %vm150_vm0, %v42_v52  ;;  %v47_v61 = vld [vmem:[%s4233_s0 + $0xd0] sm:$0xff]  ;;  %v120_v62 = vld [vmem:[%s4233_s0 + $0x318] sm:$0xff]  ;;  %v121_v63 = vld [vmem:[%s4233_s0 + $0x320] sm:$0xff] }
  0x33   :  { %3314 = vmatprep.mubr.msk.f32.mxu0 %vm150_vm0, %v43_v53  ;;  %v48_v0 = vld [vmem:[%s4233_s0 + $0xd8] sm:$0xff]  ;;  %v49_v1 = vld [vmem:[%s4233_s0 + $0xe0] sm:$0xff]  ;;  %v122_v2 = vld [vmem:[%s4233_s0 + $0x328] sm:$0xff] }
  0x34   :  { %3420 = vmatmul.mubr.msk.f32.gmra.mrb[24].mxu1 %vm150_vm0, %v114_v50  ;;  %v123_v3 = vld [vmem:[%s4233_s0 + $0x330] sm:$0xff]  ;;  %v50_v4 = vld [vmem:[%s4233_s0 + $0xe8] sm:$0xff]  ;;  %v124_v6 = vld [vmem:[%s4233_s0 + $0x338] sm:$0xff] }
  0x35   :  { %3422 = vmatprep.mubr.msk.f32.mxu1 %vm150_vm0, %v115_v51  ;;  %v51_v5 = vld [vmem:[%s4233_s0 + $0xf0] sm:$0xff]  ;;  %v125_v7 = vld [vmem:[%s4233_s0 + $0x340] sm:$0xff]  ;;  %v52_v8 = vld [vmem:[%s4233_s0 + $0xf8] sm:$0xff] }
  0x36   :  { %3315 = vmatmul.mubr.msk.f32.gmra.mrb[22].mxu0 %vm150_vm0, %v44_v56  ;;  %v53_v9 = vld [vmem:[%s4233_s0 + $0x100] sm:$0xff]  ;;  %v126_v10 = vld [vmem:[%s4233_s0 + $0x348] sm:$0xff]  ;;  %v127_v11 = vld [vmem:[%s4233_s0 + $0x350] sm:$0xff] }
  0x37   :  { %3317 = vmatprep.mubr.msk.f32.mxu0 %vm150_vm0, %v45_v57  ;;  %v54_v12 = vld [vmem:[%s4233_s0 + $0x108] sm:$0xff]  ;;  %v55_v13 = vld [vmem:[%s4233_s0 + $0x110] sm:$0xff]  ;;  %v128_v14 = vld [vmem:[%s4233_s0 + $0x358] sm:$0xff]  ;;  %v3560_v57 = vmov 0.0  }
  0x38   :  { %3423 = vmatmul.mubr.msk.f32.gmra.mrb[26].mxu1 %vm150_vm0, %v116_v54  ;;  %v129_v15 = vld [vmem:[%s4233_s0 + $0x360] sm:$0xff]  ;;  %v56_v16 = vld [vmem:[%s4233_s0 + $0x118] sm:$0xff]  ;;  %v130_v18 = vld [vmem:[%s4233_s0 + $0x368] sm:$0xff] }
  0x39   :  { %3425 = vmatprep.mubr.msk.f32.mxu1 %vm150_vm0, %v117_v55  ;;  %v57_v17 = vld [vmem:[%s4233_s0 + $0x120] sm:$0xff]  ;;  %v131_v19 = vld [vmem:[%s4233_s0 + $0x370] sm:$0xff]  ;;  %v58_v20 = vld [vmem:[%s4233_s0 + $0x128] sm:$0xff] }
  0x3a   :  { %3318 = vmatmul.mubr.msk.f32.gmra.mrb[24].mxu0 %vm150_vm0, %v46_v60  ;;  %v59_v21 = vld [vmem:[%s4233_s0 + $0x130] sm:$0xff]  ;;  %v132_v22 = vld [vmem:[%s4233_s0 + $0x378] sm:$0xff]  ;;  %v133_v23 = vld [vmem:[%s4233_s0 + $0x380] sm:$0xff] }
  0x3b   :  { %3320 = vmatprep.mubr.msk.f32.mxu0 %vm150_vm0, %v47_v61  ;;  %v60_v24 = vld [vmem:[%s4233_s0 + $0x138] sm:$0xff]  ;;  %v61_v25 = vld [vmem:[%s4233_s0 + $0x140] sm:$0xff]  ;;  %v134_v26 = vld [vmem:[%s4233_s0 + $0x388] sm:$0xff] }
  0x3c   :  { %3426 = vmatmul.mubr.msk.f32.gmra.mrb[28].mxu1 %vm150_vm0, %v118_v58  ;;  %v135_v27 = vld [vmem:[%s4233_s0 + $0x390] sm:$0xff]  ;;  %v62_v28 = vld [vmem:[%s4233_s0 + $0x148] sm:$0xff]  ;;  %v136_v30 = vld [vmem:[%s4233_s0 + $0x398] sm:$0xff] }
  0x3d   :  { %3428 = vmatprep.mubr.msk.f32.mxu1 %vm150_vm0, %v119_v59  ;;  %v63_v29 = vld [vmem:[%s4233_s0 + $0x150] sm:$0xff]  ;;  %v137_v31 = vld [vmem:[%s4233_s0 + $0x3a0] sm:$0xff]  ;;  %v64_v32 = vld [vmem:[%s4233_s0 + $0x158] sm:$0xff] }
  0x3e   :  { %3321 = vmatmul.mubr.msk.f32.gmra.mrb[26].mxu0 %vm150_vm0, %v48_v0  ;;  %v65_v33 = vld [vmem:[%s4233_s0 + $0x160] sm:$0xff]  ;;  %v138_v34 = vld [vmem:[%s4233_s0 + $0x3a8] sm:$0xff]  ;;  %v139_v35 = vld [vmem:[%s4233_s0 + $0x3b0] sm:$0xff] }
  0x3f   :  { %3323 = vmatprep.mubr.msk.f32.mxu0 %vm150_vm0, %v49_v1  ;;  %v66_v36 = vld [vmem:[%s4233_s0 + $0x168] sm:$0xff]  ;;  %v67_v37 = vld [vmem:[%s4233_s0 + $0x170] sm:$0xff]  ;;  %v140_v38 = vld [vmem:[%s4233_s0 + $0x3b8] sm:$0xff] }
  0x40   :  { %3429 = vmatmul.mubr.msk.f32.gmra.mrb[30].mxu1 %vm150_vm0, %v120_v62  ;;  %v141_v39 = vld [vmem:[%s4233_s0 + $0x3c0] sm:$0xff]  ;;  %v68_v40 = vld [vmem:[%s4233_s0 + $0x178] sm:$0xff]  ;;  %v142_v42 = vld [vmem:[%s4233_s0 + $0x3c8] sm:$0xff] }
  0x41   :  { %3431 = vmatprep.mubr.msk.f32.mxu1 %vm150_vm0, %v121_v63  ;;  %v69_v41 = vld [vmem:[%s4233_s0 + $0x180] sm:$0xff]  ;;  %v143_v43 = vld [vmem:[%s4233_s0 + $0x3d0] sm:$0xff]  ;;  %v70_v44 = vld [vmem:[%s4233_s0 + $0x188] sm:$0xff] }
  0x42   :  { %3324 = vmatmul.mubr.msk.f32.gmra.mrb[28].mxu0 %vm150_vm0, %v50_v4  ;;  %v71_v45 = vld [vmem:[%s4233_s0 + $0x190] sm:$0xff]  ;;  %v144_v46 = vld [vmem:[%s4233_s0 + $0x3d8] sm:$0xff]  ;;  %v145_v47 = vld [vmem:[%s4233_s0 + $0x3e0] sm:$0xff] }
  0x43   :  { %3326 = vmatprep.mubr.msk.f32.mxu0 %vm150_vm0, %v51_v5  ;;  %v72_v48 = vld [vmem:[%s4233_s0 + $0x198] sm:$0xff]  ;;  %v73_v49 = vld [vmem:[%s4233_s0 + $0x1a0] sm:$0xff]  ;;  %v146_v50 = vld [vmem:[%s4233_s0 + $0x3e8] sm:$0xff] }
  0x44   :  { %3432 = vmatmul.mubr.msk.f32.gmra.mrb[32].mxu1 %vm150_vm0, %v122_v2  ;;  %v147_v51 = vld [vmem:[%s4233_s0 + $0x3f0] sm:$0xff]  ;;  %v74_v52 = vld [vmem:[%s4233_s0 + $0x1a8] sm:$0xff]  ;;  %v148_v54 = vld [vmem:[%s4233_s0 + $0x3f8] sm:$0xff] }
  0x45   :  { %3434 = vmatprep.mubr.msk.f32.mxu1 %vm150_vm0, %v123_v3  ;;  %v75_v53 = vld [vmem:[%s4233_s0 + $0x1b0] sm:$0xff]  ;;  %v76_v55 = vld [vmem:[%s4233_s0 + $0x1b8] sm:$0xff]  ;;  %v77_v56 = vld [vmem:[%s4233_s0 + $0x1c0] sm:$0xff] }
  0x46   :  { %3327 = vmatmul.mubr.msk.f32.gmra.mrb[30].mxu0 %vm150_vm0, %v52_v8  ;;  %v1880_v58 = vld [vmem:[%s4236_s3] sm:$0xff]  ;;  %v1883_v59 = vld [vmem:[%s4234_s1 + $0x10] sm:$0xff]  ;;  %v1886_v60 = vld [vmem:[%s4234_s1 + $0x28] sm:$0xff] }
  0x47   :  { %3329 = vmatprep.mubr.msk.f32.mxu0 %vm150_vm0, %v53_v9  ;;  %v78_v61 = vld [vmem:[%s4233_s0 + $0x1c8] sm:$0xff]  ;;  %v79_v62 = vld [vmem:[%s4233_s0 + $0x1d0] sm:$0xff]  ;;  %v1885_v63 = vld [vmem:[%s4234_s1 + $0x20] sm:$0xff] }
  0x48   :  { %3435 = vmatmul.mubr.msk.f32.gmra.mrb[34].mxu1 %vm150_vm0, %v124_v6  ;;  %v1888_v0 = vld [vmem:[%s4234_s1 + $0x38] sm:$0xff]  ;;  %v81_v2 = vld [vmem:[%s4233_s0 + $0x1e0] sm:$0xff]  ;;  %v1887_v3 = vld [vmem:[%s4234_s1 + $0x30] sm:$0xff] }
  0x49   :  { %3437 = vmatprep.mubr.msk.f32.mxu1 %vm150_vm0, %v125_v7  ;;  %v80_v1 = vld [vmem:[%s4233_s0 + $0x1d8] sm:$0xff]  ;;  %v82_v4 = vld [vmem:[%s4233_s0 + $0x1e8] sm:$0xff]  ;;  %v83_v5 = vld [vmem:[%s4233_s0 + $0x1f0] sm:$0xff] }
  0x4a   :  { %3330 = vmatmul.mubr.msk.f32.gmra.mrb[32].mxu0 %vm150_vm0, %v54_v12  ;;  %v84_v6 = vld [vmem:[%s4233_s0 + $0x1f8] sm:$0xff]  ;;  %v85_v7 = vld [vmem:[%s4233_s0 + $0x200] sm:$0xff]  ;;  %v86_v8 = vld [vmem:[%s4233_s0 + $0x208] sm:$0xff] }
  0x4b   :  { %3332 = vmatprep.mubr.msk.f32.mxu0 %vm150_vm0, %v55_v13  ;;  %v87_v9 = vld [vmem:[%s4233_s0 + $0x210] sm:$0xff] }
  0x4c   :  { %3438 = vmatmul.mubr.msk.f32.gmra.mrb[36].mxu1 %vm150_vm0, %v126_v10  ;;  %v88_v10 = vld [vmem:[%s4233_s0 + $0x218] sm:$0xff]  ;;  %s3561_s0 = smov [#allocation2]  }
  0x4d   :  { %3440 = vmatprep.mubr.msk.f32.mxu1 %vm150_vm0, %v127_v11  ;;  %s2354_s6 = sshll.u32 %s3561_s0, 4  ;;  %s2355_s6 = int_to_ptr.vmem [resolvable:$true] %s2354_s6 }
  0x4e   :  { %3333 = vmatmul.mubr.msk.f32.gmra.mrb[34].mxu0 %vm150_vm0, %v56_v16  ;;  %s3512_s7 = scalar_lea.vmem %s2355_s6, 8192  ;;  %p3517_p1 = scmp.lt.s32.totalorder %s2355_s6, %s2355_s6 }
  0x4f   :  { %3335 = vmatprep.mubr.msk.f32.mxu0 %vm150_vm0, %v57_v17  ;;  %p3513_p0 = scmp.ne.s32.totalorder %s2355_s6, %s3512_s7  ;;  %p3518_p2 = scmp.lt.s32.totalorder %s3512_s7, %s3512_s7 }
  0x50   :  { %3441 = vmatmul.mubr.msk.f32.gmra.mrb[38].mxu1 %vm150_vm0, %v128_v14 }
  0x51   :  { %3443 = vmatprep.mubr.msk.f32.mxu1 %vm150_vm0, %v129_v15  ;;  %p3519_p3 = por %p3518_p2, %p3517_p1 }
  0x52   :  { %3336 = vmatmul.mubr.msk.f32.gmra.mrb[36].mxu0 %vm150_vm0, %v58_v20 }
  0x53   :  { %3338 = vmatprep.mubr.msk.f32.mxu0 %vm150_vm0, %v59_v21  ;;  %p3520_p4 = pnand %p3519_p3, %p3513_p0 }
  0x54   :  { %3444 = vmatmul.mubr.msk.f32.gmra.mrb[40].mxu1 %vm150_vm0, %v130_v18 }
  0x55   :  { %3446 = vmatprep.mubr.msk.f32.mxu1 %vm150_vm0, %v131_v19 }
  0x56   :  { %3339 = vmatmul.mubr.msk.f32.gmra.mrb[38].mxu0 %vm150_vm0, %v60_v24 }
  0x57   :  { %3341 = vmatprep.mubr.msk.f32.mxu0 %vm150_vm0, %v61_v25 }
  0x58   :  { %3447 = vmatmul.mubr.msk.f32.gmra.mrb[42].mxu1 %vm150_vm0, %v132_v22 }
  0x59   :  { %3449 = vmatprep.mubr.msk.f32.mxu1 %vm150_vm0, %v133_v23 }
  0x5a   :  { %3342 = vmatmul.mubr.msk.f32.gmra.mrb[40].mxu0 %vm150_vm0, %v62_v28 }
  0x5b   :  { %3344 = vmatprep.mubr.msk.f32.mxu0 %vm150_vm0, %v63_v29 }
  0x5c   :  { %3450 = vmatmul.mubr.msk.f32.gmra.mrb[44].mxu1 %vm150_vm0, %v134_v26 }
  0x5d   :  { %3452 = vmatprep.mubr.msk.f32.mxu1 %vm150_vm0, %v135_v27 }
  0x5e   :  { %3345 = vmatmul.mubr.msk.f32.gmra.mrb[42].mxu0 %vm150_vm0, %v64_v32 }
  0x5f   :  { %3347 = vmatprep.mubr.msk.f32.mxu0 %vm150_vm0, %v65_v33 }
  0x60   :  { %3453 = vmatmul.mubr.msk.f32.gmra.mrb[46].mxu1 %vm150_vm0, %v136_v30 }
  0x61   :  { %3455 = vmatprep.mubr.msk.f32.mxu1 %vm150_vm0, %v137_v31 }
  0x62   :  { %3348 = vmatmul.mubr.msk.f32.gmra.mrb[44].mxu0 %vm150_vm0, %v66_v36 }
  0x63   :  { %3350 = vmatprep.mubr.msk.f32.mxu0 %vm150_vm0, %v67_v37 }
  0x64   :  { %3456 = vmatmul.mubr.msk.f32.gmra.mrb[48].mxu1 %vm150_vm0, %v138_v34 }
  0x65   :  { %3458 = vmatprep.mubr.msk.f32.mxu1 %vm150_vm0, %v139_v35 }
  0x66   :  { %3351 = vmatmul.mubr.msk.f32.gmra.mrb[46].mxu0 %vm150_vm0, %v68_v40 }
  0x67   :  { %3353 = vmatprep.mubr.msk.f32.mxu0 %vm150_vm0, %v69_v41 }
  0x68   :  { %3459 = vmatmul.mubr.msk.f32.gmra.mrb[50].mxu1 %vm150_vm0, %v140_v38 }
  0x69   :  { %3461 = vmatprep.mubr.msk.f32.mxu1 %vm150_vm0, %v141_v39 }
  0x6a   :  { %3354 = vmatmul.mubr.msk.f32.gmra.mrb[48].mxu0 %vm150_vm0, %v70_v44 }
  0x6b   :  { %3356 = vmatprep.mubr.msk.f32.mxu0 %vm150_vm0, %v71_v45 }
  0x6c   :  { %3462 = vmatmul.mubr.msk.f32.gmra.mrb[52].mxu1 %vm150_vm0, %v142_v42 }
  0x6d   :  { %3464 = vmatprep.mubr.msk.f32.mxu1 %vm150_vm0, %v143_v43 }
  0x6e   :  { %3357 = vmatmul.mubr.msk.f32.gmra.mrb[50].mxu0 %vm150_vm0, %v72_v48 }
  0x6f   :  { %3359 = vmatprep.mubr.msk.f32.mxu0 %vm150_vm0, %v73_v49 }
  0x70   :  { %3465 = vmatmul.mubr.msk.f32.gmra.mrb[54].mxu1 %vm150_vm0, %v144_v46 }
  0x71   :  { %3467 = vmatprep.mubr.msk.f32.mxu1 %vm150_vm0, %v145_v47 }
  0x72   :  { %3360 = vmatmul.mubr.msk.f32.gmra.mrb[52].mxu0 %vm150_vm0, %v74_v52 }
  0x73   :  { %3362 = vmatprep.mubr.msk.f32.mxu0 %vm150_vm0, %v75_v53 }
  0x74   :  { %3468 = vmatmul.mubr.msk.f32.gmra.mrb[56].mxu1 %vm150_vm0, %v146_v50 }
  0x75   :  { %3470 = vmatprep.mubr.msk.f32.mxu1 %vm150_vm0, %v147_v51 }
  0x76   :  { %3363 = vmatmul.mubr.msk.f32.gmra.mrb[54].mxu0 %vm150_vm0, %v76_v55 }
  0x77   :  { %3365 = vmatprep.mubr.msk.f32.mxu0 %vm150_vm0, %v77_v56 }
  0x78   :  { %3471 = vmatmul.mubr.msk.f32.gmra.mrb[58].mxu1 %vm150_vm0, %v148_v54 }
  0x79   :  { %1956 = vmatprep.mubr.f32.mxu1 %v3560_v57 }
  0x7a   :  { %3366 = vmatmul.mubr.msk.f32.gmra.mrb[56].mxu0 %vm150_vm0, %v78_v61 }
  0x7b   :  { %3368 = vmatprep.mubr.msk.f32.mxu0 %vm150_vm0, %v79_v62 }
  0x7c   :  { %2635 = vmatmul.mubr.msk.f32.vlgmr.msra.gmra.mrb[60].mxu1 %vm150_vm0, %v1880_v58 }
  0x7d   :  { %1964 = vmatpush1.msra.mxu1 %v1883_v59  ;;  %2027 = vmatprep.mubr.f32.mxu1 %v3560_v57 }
  0x7e   :  { %2034 = vmatprep.subr.mxu1 %v1886_v60  ;;  %3369 = vmatmul.mubr.msk.f32.gmra.mrb[58].mxu0 %vm150_vm0, %v80_v1 }
  0x7f   :  { %3371 = vmatprep.mubr.msk.f32.mxu0 %vm150_vm0, %v81_v2 }
  0x80   :  { %2636 = vmatmul.mubr.msk.f32.vlgmr.msra.gmra.mrb[62].mxu1 %vm150_vm0, %v1880_v58 }
  0x81   :  { %2035 = vmatpush1.msra.mxu1 %v1885_v63  ;;  %2098 = vmatprep.mubr.f32.mxu1 %v3560_v57 }
  0x82   :  { %2105 = vmatprep.subr.mxu1 %v1888_v0  ;;  %3372 = vmatmul.mubr.msk.f32.gmra.mrb[60].mxu0 %vm150_vm0, %v82_v4 }
  0x83   :  { %3374 = vmatprep.mubr.msk.f32.mxu0 %vm150_vm0, %v83_v5 }
  0x84   :  { %2637 = vmatmul.mubr.msk.f32.vlgmr.msra.gmra.mrb[64].mxu1 %vm150_vm0, %v1880_v58 }
  0x85   :  { %2106 = vmatpush1.msra.mxu1 %v1887_v3  ;;  %2169 = vmatprep.mubr.f32.mxu1 %v3560_v57 }
  0x86   :  { %3375 = vmatmul.mubr.msk.f32.gmra.mrb[62].mxu0 %vm150_vm0, %v84_v6 }
  0x87   :  { %3377 = vmatprep.mubr.msk.f32.mxu0 %vm150_vm0, %v85_v7 }
  0x88   :  { %2638 = vmatmul.mubr.msk.f32.vlgmr.msra.gmra.mrb[66].mxu1 %vm150_vm0, %v1880_v58 }
  0x8a   :  { %3378 = vmatmul.mubr.msk.f32.gmra.mrb[64].mxu0 %vm150_vm0, %v86_v8 }
  0x8b   :  { %3380 = vmatprep.mubr.msk.f32.mxu0 %vm150_vm0, %v87_v9 }
  0x8e   :  { %3381 = vmatmul.mubr.msk.f32.gmra.mrb[66].mxu0 %vm150_vm0, %v88_v10 }
  0xd7   :  { %v3385_v11 = vpop.f32.mrb[0].mxu1 }
  0xd8   :  { %v941_v12 = vpop.f32.mrb[1].mxu1 }
  0xd9   :  { %v2940_v13 = vpack.c.bf16 %v3385_v11, %v941_v12 }
  0xda   :  { %v3283_v19 = vpop.f32.mrb[0].mxu0 }
  0xdb   :  { %3120 = vst [vmem:[#allocation2 + $0x110] sm:$0xff] %v2940_v13   ;;  %v3388_v14 = vpop.f32.mrb[2].mxu1  ;;  %v601_v21 = vpop.f32.mrb[1].mxu0 }
  0xdc   :  { %v951_v15 = vpop.f32.mrb[3].mxu1  ;;  %v2770_v22 = vpack.c.bf16 %v3283_v19, %v601_v21 }
  0xdd   :  { %v2945_v16 = vpack.c.bf16 %v3388_v14, %v951_v15 }
  0xde   :  { %2771 = vst [vmem:[#allocation2] sm:$0xff] %v2770_v22   ;;  %v3286_v25 = vpop.f32.mrb[2].mxu0 }
  0xdf   :  { %3121 = vst [vmem:[#allocation2 + $0x118] sm:$0xff] %v2945_v16   ;;  %v3391_v17 = vpop.f32.mrb[4].mxu1  ;;  %v611_v27 = vpop.f32.mrb[3].mxu0 }
  0xe0   :  { %v961_v18 = vpop.f32.mrb[5].mxu1  ;;  %v2775_v28 = vpack.c.bf16 %v3286_v25, %v611_v27 }
  0xe1   :  { %v2950_v20 = vpack.c.bf16 %v3391_v17, %v961_v18 }
  0xe2   :  { %3087 = vst [vmem:[#allocation2 + $0x8] sm:$0xff] %v2775_v28   ;;  %v3289_v31 = vpop.f32.mrb[4].mxu0 }
  0xe3   :  { %3122 = vst [vmem:[#allocation2 + $0x120] sm:$0xff] %v2950_v20   ;;  %v3394_v23 = vpop.f32.mrb[6].mxu1  ;;  %v621_v33 = vpop.f32.mrb[5].mxu0 }
  0xe4   :  { %v971_v24 = vpop.f32.mrb[7].mxu1  ;;  %v2780_v34 = vpack.c.bf16 %v3289_v31, %v621_v33 }
  0xe5   :  { %v2955_v26 = vpack.c.bf16 %v3394_v23, %v971_v24 }
  0xe6   :  { %3088 = vst [vmem:[#allocation2 + $0x10] sm:$0xff] %v2780_v34   ;;  %v3292_v37 = vpop.f32.mrb[6].mxu0 }
  0xe7   :  { %3123 = vst [vmem:[#allocation2 + $0x128] sm:$0xff] %v2955_v26   ;;  %v3397_v29 = vpop.f32.mrb[8].mxu1  ;;  %v631_v39 = vpop.f32.mrb[7].mxu0 }
  0xe8   :  { %v981_v30 = vpop.f32.mrb[9].mxu1  ;;  %v2785_v40 = vpack.c.bf16 %v3292_v37, %v631_v39 }
  0xe9   :  { %v2960_v32 = vpack.c.bf16 %v3397_v29, %v981_v30 }
  0xea   :  { %3089 = vst [vmem:[#allocation2 + $0x18] sm:$0xff] %v2785_v40   ;;  %v3295_v43 = vpop.f32.mrb[8].mxu0 }
  0xeb   :  { %3124 = vst [vmem:[#allocation2 + $0x130] sm:$0xff] %v2960_v32   ;;  %v3400_v35 = vpop.f32.mrb[10].mxu1  ;;  %v641_v45 = vpop.f32.mrb[9].mxu0 }
  0xec   :  { %v991_v36 = vpop.f32.mrb[11].mxu1  ;;  %v2790_v46 = vpack.c.bf16 %v3295_v43, %v641_v45 }
  0xed   :  { %v2965_v38 = vpack.c.bf16 %v3400_v35, %v991_v36 }
  0xee   :  { %3090 = vst [vmem:[#allocation2 + $0x20] sm:$0xff] %v2790_v46   ;;  %v3298_v49 = vpop.f32.mrb[10].mxu0 }
  0xef   :  { %3125 = vst [vmem:[#allocation2 + $0x138] sm:$0xff] %v2965_v38   ;;  %v3403_v41 = vpop.f32.mrb[12].mxu1  ;;  %v651_v51 = vpop.f32.mrb[11].mxu0 }
  0xf0   :  { %v1001_v42 = vpop.f32.mrb[13].mxu1  ;;  %v2795_v52 = vpack.c.bf16 %v3298_v49, %v651_v51 }
  0xf1   :  { %v2970_v44 = vpack.c.bf16 %v3403_v41, %v1001_v42 }
  0xf2   :  { %3091 = vst [vmem:[#allocation2 + $0x28] sm:$0xff] %v2795_v52   ;;  %v3301_v55 = vpop.f32.mrb[12].mxu0 }
  0xf3   :  { %3126 = vst [vmem:[#allocation2 + $0x140] sm:$0xff] %v2970_v44   ;;  %v3406_v47 = vpop.f32.mrb[14].mxu1  ;;  %v661_v57 = vpop.f32.mrb[13].mxu0 }
  0xf4   :  { %v1011_v48 = vpop.f32.mrb[15].mxu1  ;;  %v2800_v58 = vpack.c.bf16 %v3301_v55, %v661_v57 }
  0xf5   :  { %v2975_v50 = vpack.c.bf16 %v3406_v47, %v1011_v48 }
  0xf6   :  { %3092 = vst [vmem:[#allocation2 + $0x30] sm:$0xff] %v2800_v58   ;;  %v3304_v61 = vpop.f32.mrb[14].mxu0 }
  0xf7   :  { %3127 = vst [vmem:[#allocation2 + $0x148] sm:$0xff] %v2975_v50   ;;  %v3409_v53 = vpop.f32.mrb[16].mxu1  ;;  %v671_v63 = vpop.f32.mrb[15].mxu0 }
  0xf8   :  { %v1021_v54 = vpop.f32.mrb[17].mxu1  ;;  %v2805_v0 = vpack.c.bf16 %v3304_v61, %v671_v63 }
  0xf9   :  { %v2980_v56 = vpack.c.bf16 %v3409_v53, %v1021_v54 }
  0xfa   :  { %3093 = vst [vmem:[#allocation2 + $0x38] sm:$0xff] %v2805_v0   ;;  %v3307_v3 = vpop.f32.mrb[16].mxu0 }
  0xfb   :  { %3128 = vst [vmem:[#allocation2 + $0x150] sm:$0xff] %v2980_v56   ;;  %v3412_v59 = vpop.f32.mrb[18].mxu1  ;;  %v681_v5 = vpop.f32.mrb[17].mxu0 }
  0xfc   :  { %v1031_v60 = vpop.f32.mrb[19].mxu1  ;;  %v2810_v6 = vpack.c.bf16 %v3307_v3, %v681_v5 }
  0xfd   :  { %v2985_v62 = vpack.c.bf16 %v3412_v59, %v1031_v60 }
  0xfe   :  { %3094 = vst [vmem:[#allocation2 + $0x40] sm:$0xff] %v2810_v6  }
  0xff   :  { %3129 = vst [vmem:[#allocation2 + $0x158] sm:$0xff] %v2985_v62   ;;  %v3415_v1 = vpop.f32.mrb[20].mxu1 }
 0x100   :  { %v1041_v2 = vpop.f32.mrb[21].mxu1 }
 0x101   :  { %v2990_v4 = vpack.c.bf16 %v3415_v1, %v1041_v2  ;;  %v3310_v9 = vpop.f32.mrb[18].mxu0 }
 0x102   :  { %v691_v11 = vpop.f32.mrb[19].mxu0 }
 0x103   :  { %3130 = vst [vmem:[#allocation2 + $0x160] sm:$0xff] %v2990_v4   ;;  %v3418_v7 = vpop.f32.mrb[22].mxu1  ;;  %v2815_v12 = vpack.c.bf16 %v3310_v9, %v691_v11 }
 0x104   :  { %v1051_v8 = vpop.f32.mrb[23].mxu1 }
 0x105   :  { %v2995_v10 = vpack.c.bf16 %v3418_v7, %v1051_v8  ;;  %3095 = vst [vmem:[#allocation2 + $0x48] sm:$0xff] %v2815_v12   ;;  %v3313_v15 = vpop.f32.mrb[20].mxu0 }
 0x106   :  { %v701_v17 = vpop.f32.mrb[21].mxu0 }
 0x107   :  { %3131 = vst [vmem:[#allocation2 + $0x168] sm:$0xff] %v2995_v10   ;;  %v3421_v13 = vpop.f32.mrb[24].mxu1  ;;  %v2820_v18 = vpack.c.bf16 %v3313_v15, %v701_v17 }
 0x108   :  { %v1061_v14 = vpop.f32.mrb[25].mxu1 }
 0x109   :  { %v3000_v16 = vpack.c.bf16 %v3421_v13, %v1061_v14  ;;  %3096 = vst [vmem:[#allocation2 + $0x50] sm:$0xff] %v2820_v18   ;;  %v3316_v21 = vpop.f32.mrb[22].mxu0 }
 0x10a   :  { %v711_v23 = vpop.f32.mrb[23].mxu0 }
 0x10b   :  { %3132 = vst [vmem:[#allocation2 + $0x170] sm:$0xff] %v3000_v16   ;;  %v3424_v19 = vpop.f32.mrb[26].mxu1  ;;  %v2825_v24 = vpack.c.bf16 %v3316_v21, %v711_v23 }
 0x10c   :  { %v1071_v20 = vpop.f32.mrb[27].mxu1 }
 0x10d   :  { %v3005_v22 = vpack.c.bf16 %v3424_v19, %v1071_v20  ;;  %3097 = vst [vmem:[#allocation2 + $0x58] sm:$0xff] %v2825_v24   ;;  %v3319_v27 = vpop.f32.mrb[24].mxu0 }
 0x10e   :  { %v721_v29 = vpop.f32.mrb[25].mxu0 }
 0x10f   :  { %3133 = vst [vmem:[#allocation2 + $0x178] sm:$0xff] %v3005_v22   ;;  %v3427_v25 = vpop.f32.mrb[28].mxu1  ;;  %v2830_v30 = vpack.c.bf16 %v3319_v27, %v721_v29 }
 0x110   :  { %v1081_v26 = vpop.f32.mrb[29].mxu1 }
 0x111   :  { %v3010_v28 = vpack.c.bf16 %v3427_v25, %v1081_v26  ;;  %3098 = vst [vmem:[#allocation2 + $0x60] sm:$0xff] %v2830_v30   ;;  %v3322_v33 = vpop.f32.mrb[26].mxu0 }
 0x112   :  { %v731_v35 = vpop.f32.mrb[27].mxu0 }
 0x113   :  { %3134 = vst [vmem:[#allocation2 + $0x180] sm:$0xff] %v3010_v28   ;;  %v3430_v31 = vpop.f32.mrb[30].mxu1  ;;  %v2835_v36 = vpack.c.bf16 %v3322_v33, %v731_v35 }
 0x114   :  { %v1091_v32 = vpop.f32.mrb[31].mxu1 }
 0x115   :  { %v3015_v34 = vpack.c.bf16 %v3430_v31, %v1091_v32  ;;  %3099 = vst [vmem:[#allocation2 + $0x68] sm:$0xff] %v2835_v36   ;;  %v3325_v39 = vpop.f32.mrb[28].mxu0 }
 0x116   :  { %v741_v41 = vpop.f32.mrb[29].mxu0 }
 0x117   :  { %3135 = vst [vmem:[#allocation2 + $0x188] sm:$0xff] %v3015_v34   ;;  %v3433_v37 = vpop.f32.mrb[32].mxu1  ;;  %v2840_v42 = vpack.c.bf16 %v3325_v39, %v741_v41 }
 0x118   :  { %v1101_v38 = vpop.f32.mrb[33].mxu1 }
 0x119   :  { %v3020_v40 = vpack.c.bf16 %v3433_v37, %v1101_v38  ;;  %3100 = vst [vmem:[#allocation2 + $0x70] sm:$0xff] %v2840_v42   ;;  %v3328_v45 = vpop.f32.mrb[30].mxu0 }
 0x11a   :  { %v751_v47 = vpop.f32.mrb[31].mxu0 }
 0x11b   :  { %3136 = vst [vmem:[#allocation2 + $0x190] sm:$0xff] %v3020_v40   ;;  %v3436_v43 = vpop.f32.mrb[34].mxu1  ;;  %v2845_v48 = vpack.c.bf16 %v3328_v45, %v751_v47 }
 0x11c   :  { %v1111_v44 = vpop.f32.mrb[35].mxu1 }
 0x11d   :  { %v3025_v46 = vpack.c.bf16 %v3436_v43, %v1111_v44  ;;  %3101 = vst [vmem:[#allocation2 + $0x78] sm:$0xff] %v2845_v48   ;;  %v3331_v51 = vpop.f32.mrb[32].mxu0 }
 0x11e   :  { %v761_v53 = vpop.f32.mrb[33].mxu0 }
 0x11f   :  { %3137 = vst [vmem:[#allocation2 + $0x198] sm:$0xff] %v3025_v46   ;;  %v3439_v49 = vpop.f32.mrb[36].mxu1  ;;  %v2850_v54 = vpack.c.bf16 %v3331_v51, %v761_v53 }
 0x120   :  { %v1121_v50 = vpop.f32.mrb[37].mxu1 }
 0x121   :  { %v3030_v52 = vpack.c.bf16 %v3439_v49, %v1121_v50  ;;  %3102 = vst [vmem:[#allocation2 + $0x80] sm:$0xff] %v2850_v54   ;;  %v3334_v57 = vpop.f32.mrb[34].mxu0 }
 0x122   :  { %v771_v59 = vpop.f32.mrb[35].mxu0 }
 0x123   :  { %3138 = vst [vmem:[#allocation2 + $0x1a0] sm:$0xff] %v3030_v52   ;;  %v3442_v55 = vpop.f32.mrb[38].mxu1  ;;  %v2855_v60 = vpack.c.bf16 %v3334_v57, %v771_v59 }
 0x124   :  { %v1131_v56 = vpop.f32.mrb[39].mxu1 }
 0x125   :  { %v3035_v58 = vpack.c.bf16 %v3442_v55, %v1131_v56  ;;  %3103 = vst [vmem:[#allocation2 + $0x88] sm:$0xff] %v2855_v60   ;;  %v3337_v63 = vpop.f32.mrb[36].mxu0 }
 0x126   :  { %v781_v1 = vpop.f32.mrb[37].mxu0 }
 0x127   :  { %3139 = vst [vmem:[#allocation2 + $0x1a8] sm:$0xff] %v3035_v58   ;;  %v3445_v61 = vpop.f32.mrb[40].mxu1  ;;  %v2860_v2 = vpack.c.bf16 %v3337_v63, %v781_v1 }
 0x128   :  { %v1141_v62 = vpop.f32.mrb[41].mxu1 }
 0x129   :  { %v3040_v0 = vpack.c.bf16 %v3445_v61, %v1141_v62  ;;  %3104 = vst [vmem:[#allocation2 + $0x90] sm:$0xff] %v2860_v2   ;;  %v3340_v5 = vpop.f32.mrb[38].mxu0 }
 0x12a   :  { %v791_v7 = vpop.f32.mrb[39].mxu0 }
 0x12b   :  { %3140 = vst [vmem:[#allocation2 + $0x1b0] sm:$0xff] %v3040_v0   ;;  %v3448_v3 = vpop.f32.mrb[42].mxu1  ;;  %v2865_v8 = vpack.c.bf16 %v3340_v5, %v791_v7 }
 0x12c   :  { %v1151_v4 = vpop.f32.mrb[43].mxu1 }
 0x12d   :  { %v3045_v6 = vpack.c.bf16 %v3448_v3, %v1151_v4  ;;  %3105 = vst [vmem:[#allocation2 + $0x98] sm:$0xff] %v2865_v8   ;;  %v3343_v11 = vpop.f32.mrb[40].mxu0 }
 0x12e   :  { %v801_v13 = vpop.f32.mrb[41].mxu0 }
 0x12f   :  { %3141 = vst [vmem:[#allocation2 + $0x1b8] sm:$0xff] %v3045_v6   ;;  %v3451_v9 = vpop.f32.mrb[44].mxu1  ;;  %v2870_v14 = vpack.c.bf16 %v3343_v11, %v801_v13 }
 0x130   :  { %v1161_v10 = vpop.f32.mrb[45].mxu1 }
 0x131   :  { %v3050_v12 = vpack.c.bf16 %v3451_v9, %v1161_v10  ;;  %3106 = vst [vmem:[#allocation2 + $0xa0] sm:$0xff] %v2870_v14   ;;  %v3346_v17 = vpop.f32.mrb[42].mxu0 }
 0x132   :  { %v811_v19 = vpop.f32.mrb[43].mxu0 }
 0x133   :  { %3142 = vst [vmem:[#allocation2 + $0x1c0] sm:$0xff] %v3050_v12   ;;  %v3454_v15 = vpop.f32.mrb[46].mxu1  ;;  %v2875_v20 = vpack.c.bf16 %v3346_v17, %v811_v19 }
 0x134   :  { %v1171_v16 = vpop.f32.mrb[47].mxu1 }
 0x135   :  { %v3055_v18 = vpack.c.bf16 %v3454_v15, %v1171_v16  ;;  %3107 = vst [vmem:[#allocation2 + $0xa8] sm:$0xff] %v2875_v20   ;;  %v3349_v23 = vpop.f32.mrb[44].mxu0 }
 0x136   :  { %v821_v25 = vpop.f32.mrb[45].mxu0 }
 0x137   :  { %3143 = vst [vmem:[#allocation2 + $0x1c8] sm:$0xff] %v3055_v18   ;;  %v3457_v21 = vpop.f32.mrb[48].mxu1  ;;  %v2880_v26 = vpack.c.bf16 %v3349_v23, %v821_v25 }
 0x138   :  { %v1181_v22 = vpop.f32.mrb[49].mxu1 }
 0x139   :  { %v3060_v24 = vpack.c.bf16 %v3457_v21, %v1181_v22  ;;  %3108 = vst [vmem:[#allocation2 + $0xb0] sm:$0xff] %v2880_v26   ;;  %v3352_v29 = vpop.f32.mrb[46].mxu0 }
 0x13a   :  { %v831_v31 = vpop.f32.mrb[47].mxu0 }
 0x13b   :  { %3144 = vst [vmem:[#allocation2 + $0x1d0] sm:$0xff] %v3060_v24   ;;  %v3460_v27 = vpop.f32.mrb[50].mxu1  ;;  %v2885_v32 = vpack.c.bf16 %v3352_v29, %v831_v31 }
 0x13c   :  { %v1191_v28 = vpop.f32.mrb[51].mxu1 }
 0x13d   :  { %v3065_v30 = vpack.c.bf16 %v3460_v27, %v1191_v28  ;;  %3109 = vst [vmem:[#allocation2 + $0xb8] sm:$0xff] %v2885_v32   ;;  %v3355_v35 = vpop.f32.mrb[48].mxu0 }
 0x13e   :  { %v841_v37 = vpop.f32.mrb[49].mxu0 }
 0x13f   :  { %3145 = vst [vmem:[#allocation2 + $0x1d8] sm:$0xff] %v3065_v30   ;;  %v3463_v33 = vpop.f32.mrb[52].mxu1  ;;  %v2890_v38 = vpack.c.bf16 %v3355_v35, %v841_v37 }
 0x140   :  { %v1201_v34 = vpop.f32.mrb[53].mxu1 }
 0x141   :  { %v3070_v36 = vpack.c.bf16 %v3463_v33, %v1201_v34  ;;  %3110 = vst [vmem:[#allocation2 + $0xc0] sm:$0xff] %v2890_v38   ;;  %v3358_v41 = vpop.f32.mrb[50].mxu0 }
 0x142   :  { %v851_v43 = vpop.f32.mrb[51].mxu0 }
 0x143   :  { %3146 = vst [vmem:[#allocation2 + $0x1e0] sm:$0xff] %v3070_v36   ;;  %v3466_v39 = vpop.f32.mrb[54].mxu1  ;;  %v2895_v44 = vpack.c.bf16 %v3358_v41, %v851_v43 }
 0x144   :  { %v1211_v40 = vpop.f32.mrb[55].mxu1 }
 0x145   :  { %v3075_v42 = vpack.c.bf16 %v3466_v39, %v1211_v40  ;;  %3111 = vst [vmem:[#allocation2 + $0xc8] sm:$0xff] %v2895_v44   ;;  %v3361_v47 = vpop.f32.mrb[52].mxu0 }
 0x146   :  { %v861_v49 = vpop.f32.mrb[53].mxu0 }
 0x147   :  { %3147 = vst [vmem:[#allocation2 + $0x1e8] sm:$0xff] %v3075_v42   ;;  %v3469_v45 = vpop.f32.mrb[56].mxu1  ;;  %v2900_v50 = vpack.c.bf16 %v3361_v47, %v861_v49 }
 0x148   :  { %v1221_v46 = vpop.f32.mrb[57].mxu1 }
 0x149   :  { %v3080_v48 = vpack.c.bf16 %v3469_v45, %v1221_v46  ;;  %3112 = vst [vmem:[#allocation2 + $0xd0] sm:$0xff] %v2900_v50   ;;  %v3364_v53 = vpop.f32.mrb[54].mxu0 }
 0x14a   :  { %v871_v55 = vpop.f32.mrb[55].mxu0 }
 0x14b   :  { %3148 = vst [vmem:[#allocation2 + $0x1f0] sm:$0xff] %v3080_v48   ;;  %v3472_v51 = vpop.f32.mrb[58].mxu1  ;;  %v2905_v56 = vpack.c.bf16 %v3364_v53, %v871_v55 }
 0x14c   :  { %v1231_v52 = vpop.f32.mrb[59].mxu1 }
 0x14d   :  { %v3085_v54 = vpack.c.bf16 %v3472_v51, %v1231_v52  ;;  %3113 = vst [vmem:[#allocation2 + $0xd8] sm:$0xff] %v2905_v56   ;;  %v3367_v62 = vpop.f32.mrb[56].mxu0 }
 0x14e   :  { %v881_v0 = vpop.f32.mrb[57].mxu0 }
 0x14f   :  { %3149 = vst [vmem:[#allocation2 + $0x1f8] sm:$0xff] %v3085_v54   ;;  %v1958_v57 = vpop.f32.mrb[60].mxu1  ;;  %v2910_v3 = vpack.c.bf16 %v3367_v62, %v881_v0 }
 0x150   :  { %v2177_v58 = vsel %vm2176_vm1, %v1958_v57, -inf  ;;  %v4142_v59 = vpop.f32.mrb[61].mxu1 }
 0x151   :  { %v2178_v60 = vrot.slane %v2177_v58, 4  ;;  %v2184_v61 = vsel %vm2176_vm1, %v4142_v59, -inf  ;;  %3114 = vst [vmem:[#allocation2 + $0xe0] sm:$0xff] %v2910_v3   ;;  %v3370_v10 = vpop.f32.mrb[58].mxu0 }
 0x152   :  { %v2185_v63 = vrot.slane %v2184_v61, 4  ;;  %v891_v13 = vpop.f32.mrb[59].mxu0 }
 0x153   :  { %v2179_v1 = vmax.f32 %v2177_v58, %v2178_v60  ;;  %v4146_v2 = vpop.f32.mrb[62].mxu1  ;;  %v2915_v17 = vpack.c.bf16 %v3370_v10, %v891_v13 }
 0x154   :  { %v2186_v4 = vmax.f32 %v2184_v61, %v2185_v63  ;;  %v2191_v5 = vsel %vm2176_vm1, %v4146_v2, -inf  ;;  %v4150_v6 = vpop.f32.mrb[63].mxu1 }
 0x155   :  { %v2180_v7 = vrot.slane %v2179_v1, 2  ;;  %v2192_v8 = vrot.slane %v2191_v5, 4  ;;  %v2198_v9 = vsel %vm2176_vm1, %v4150_v6, -inf  ;;  %3115 = vst [vmem:[#allocation2 + $0xe8] sm:$0xff] %v2915_v17   ;;  %v3373_v26 = vpop.f32.mrb[60].mxu0 }
 0x156   :  { %v2187_v11 = vrot.slane %v2186_v4, 2  ;;  %v2199_v12 = vrot.slane %v2198_v9, 4  ;;  %v901_v30 = vpop.f32.mrb[61].mxu0 }
 0x157   :  { %v2181_v14 = vmax.f32 %v2179_v1, %v2180_v7  ;;  %v2193_v15 = vmax.f32 %v2191_v5, %v2192_v8  ;;  %v4154_v16 = vpop.f32.mrb[64].mxu1  ;;  %v2920_v35 = vpack.c.bf16 %v3373_v26, %v901_v30 }
 0x158   :  { %v2188_v18 = vmax.f32 %v2186_v4, %v2187_v11  ;;  %v2200_v19 = vmax.f32 %v2198_v9, %v2199_v12  ;;  %v2205_v20 = vsel %vm2176_vm1, %v4154_v16, -inf  ;;  %v4158_v21 = vpop.f32.mrb[65].mxu1 }
 0x159   :  { %v2182_v22 = vrot.slane %v2181_v14, 1  ;;  %v2194_v23 = vrot.slane %v2193_v15, 2  ;;  %v2206_v24 = vrot.slane %v2205_v20, 4  ;;  %v2212_v25 = vsel %vm2176_vm1, %v4158_v21, -inf  ;;  %3116 = vst [vmem:[#allocation2 + $0xf0] sm:$0xff] %v2920_v35   ;;  %v3376_v45 = vpop.f32.mrb[62].mxu0 }
 0x15a   :  { %v2189_v27 = vrot.slane %v2188_v18, 1  ;;  %v2201_v28 = vrot.slane %v2200_v19, 2  ;;  %v2213_v29 = vrot.slane %v2212_v25, 4  ;;  %v911_v50 = vpop.f32.mrb[63].mxu0 }
 0x15b   :  { %v2183_v31 = vmax.f32 %v2181_v14, %v2182_v22  ;;  %v2195_v32 = vmax.f32 %v2193_v15, %v2194_v23  ;;  %v2207_v33 = vmax.f32 %v2205_v20, %v2206_v24  ;;  %v4162_v34 = vpop.f32.mrb[66].mxu1  ;;  %v2925_v8 = vpack.c.bf16 %v3376_v45, %v911_v50 }
 0x15c   :  { %v2190_v36 = vmax.f32 %v2188_v18, %v2189_v27  ;;  %v2202_v37 = vmax.f32 %v2200_v19, %v2201_v28  ;;  %v2214_v38 = vmax.f32 %v2212_v25, %v2213_v29  ;;  %v2219_v39 = vsel %vm2176_vm1, %v4162_v34, -inf  ;;  %v4166_v40 = vpop.f32.mrb[67].mxu1 }
 0x15d   :  { %v2233_v41 = vsub.f32 %v1958_v57, %v2183_v31  ;;  %v2196_v42 = vrot.slane %v2195_v32, 1  ;;  %v2208_v43 = vrot.slane %v2207_v33, 2  ;;  %v2220_v44 = vrot.slane %v2219_v39, 4  ;;  %3117 = vst [vmem:[#allocation2 + $0xf8] sm:$0xff] %v2925_v8  }
 0x15e   :  { %v2234_v46 = vsub.f32 %v4142_v59, %v2190_v36  ;;  %v2203_v47 = vrot.slane %v2202_v37, 1  ;;  %v2215_v48 = vrot.slane %v2214_v38, 2  ;;  %v2226_v49 = vsel %vm2176_vm1, %v4166_v40, -inf  ;;  %v3379_v59 = vpop.f32.mrb[64].mxu0 }
 0x15f   :  { %v2241_v51 = vmul.f32 1.442695, %v2233_v41  ;;  %v2197_v52 = vmax.f32 %v2195_v32, %v2196_v42  ;;  %v2209_v53 = vmax.f32 %v2207_v33, %v2208_v43  ;;  %v2221_v54 = vmax.f32 %v2219_v39, %v2220_v44  ;;  %v921_v3 = vpop.f32.mrb[65].mxu0 }
 0x160   :  { %v2243_v55 = vmul.f32 1.442695, %v2234_v46  ;;  %v2204_v56 = vmax.f32 %v2202_v37, %v2203_v47  ;;  %v2216_v57 = vmax.f32 %v2214_v38, %v2215_v48  ;;  %v2227_v58 = vrot.slane %v2226_v49, 4 }
 0x161   :  { %3480 = vpow2.f32 %v2241_v51  ;;  %v2235_v60 = vsub.f32 %v4146_v2, %v2197_v52  ;;  %v2210_v61 = vrot.slane %v2209_v53, 1  ;;  %v2222_v62 = vrot.slane %v2221_v54, 2  ;;  %v3382_v14 = vpop.f32.mrb[66].mxu0 }
 0x162   :  { %3482 = vpow2.f32 %v2243_v55  ;;  %v2236_v63 = vsub.f32 %v4150_v6, %v2204_v56  ;;  %v2217_v0 = vrot.slane %v2216_v57, 1  ;;  %v2228_v1 = vmax.f32 %v2226_v49, %v2227_v58  ;;  %v931_v17 = vpop.f32.mrb[67].mxu0 }
 0x163   :  { %v2245_v4 = vmul.f32 1.442695, %v2235_v60  ;;  %v2211_v5 = vmax.f32 %v2209_v53, %v2210_v61  ;;  %v2223_v7 = vmax.f32 %v2221_v54, %v2222_v62  ;;  %v2930_v12 = vpack.c.bf16 %v3379_v59, %v921_v3 }
 0x164   :  { %v2247_v9 = vmul.f32 1.442695, %v2236_v63  ;;  %v2218_v10 = vmax.f32 %v2216_v57, %v2217_v0  ;;  %v2229_v11 = vrot.slane %v2228_v1, 2  ;;  %v2935_v20 = vpack.c.bf16 %v3382_v14, %v931_v17 }
 0x165   :  { %3484 = vpow2.f32 %v2245_v4  ;;  %v2237_v2 = vsub.f32 %v4154_v16, %v2211_v5  ;;  %v2224_v13 = vrot.slane %v2223_v7, 1  ;;  %3118 = vst [vmem:[#allocation2 + $0x100] sm:$0xff] %v2930_v12  }
 0x166   :  { %3486 = vpow2.f32 %v2247_v9  ;;  %v2238_v6 = vsub.f32 %v4158_v21, %v2218_v10  ;;  %v2230_v15 = vmax.f32 %v2228_v1, %v2229_v11  ;;  %3119 = vst [vmem:[#allocation2 + $0x108] sm:$0xff] %v2935_v20  }
 0x167   :  { %v2249_v18 = vmul.f32 1.442695, %v2237_v2  ;;  %v2225_v19 = vmax.f32 %v2223_v7, %v2224_v13 }
 0x168   :  { %v2251_v22 = vmul.f32 1.442695, %v2238_v6  ;;  %v2231_v23 = vrot.slane %v2230_v15, 1 }
 0x169   :  { %3488 = vpow2.f32 %v2249_v18  ;;  %v2239_v24 = vsub.f32 %v4162_v34, %v2225_v19 }
 0x16a   :  { %3490 = vpow2.f32 %v2251_v22  ;;  %v2232_v16 = vmax.f32 %v2230_v15, %v2231_v23 }
 0x16b   :  { %3523 = shalt.err (!%p3520_p4)
}
 0x16c   :  { %s3524_s9 = scalar_lea.hbm %s4237_s4, 8192 }
 0x16d   :  { %p3525_p5 = scmp.ne.s32.totalorder %s4237_s4, %s3524_s9  ;;  %p3528_p6 = scmp.lt.u32.totalorder %s3524_s9, %s4237_s4 }
 0x16f   :  { %p3530_p7 = pnand %p3528_p6, %p3525_p5 }
 0x171   :  { %3533 = shalt.err (!%p3530_p7)
}
 0x172   :  { %s3562_s14 = smov 64   ;;  %s3563_s15 = smov 4   ;;  %v4188_v21 = vpop.eup %3480  ;;  %v2253_v25 = vmul.f32 1.442695, %v2239_v24  ;;  %v2240_v28 = vsub.f32 %v4166_v40, %v2232_v16 }
 0x173   :  { %2360 = dma.vmem_to_hbm [thread:$0]  %s2355_s6, 8192, %s4237_s4, [#allocation3], %s3562_s14, %s3562_s14, %s3563_s15   ;;  %v4190_v26 = vpop.eup %3482  ;;  %v2257_v27 = vsel %vm2176_vm1, %v4188_v21, 0.0 }
 0x174   :  { %v2258_v29 = vrot.slane %v2257_v27, 4  ;;  %v2264_v30 = vsel %vm2176_vm1, %v4190_v26, 0.0  ;;  %3492 = vpow2.f32 %v2253_v25  ;;  %v2255_v32 = vmul.f32 1.442695, %v2240_v28  ;;  %v4197_v33 = vpop.eup %3484  ;;  %s3564_s4 = smov [#allocation4]  }
 0x175   :  { %v2265_v31 = vrot.slane %v2264_v30, 4  ;;  %v4199_v35 = vpop.eup %3486  ;;  %v2271_v37 = vsel %vm2176_vm1, %v4197_v33, 0.0  ;;  %s2367_s18 = sshll.u32 %s3564_s4, 4  ;;  %s2368_s18 = int_to_ptr.vmem [resolvable:$true] %s2367_s18 }
 0x176   :  { %v2259_v34 = vadd.f32 %v2258_v29, %v2257_v27  ;;  %3494 = vpow2.f32 %v2255_v32  ;;  %v2272_v39 = vrot.slane %v2271_v37, 4  ;;  %v2278_v40 = vsel %vm2176_vm1, %v4199_v35, 0.0  ;;  %v4205_v43 = vpop.eup %3488  ;;  %s3534_s19 = scalar_lea.vmem %s2368_s18, 512  ;;  %p3539_p9 = scmp.lt.s32.totalorder %s2368_s18, %s2368_s18 }
 0x177   :  { %v2266_v36 = vadd.f32 %v2265_v31, %v2264_v30  ;;  %v2279_v42 = vrot.slane %v2278_v40, 4  ;;  %v4207_v46 = vpop.eup %3490  ;;  %v2285_v49 = vsel %vm2176_vm1, %v4205_v43, 0.0  ;;  %p3535_p8 = scmp.ne.s32.totalorder %s2368_s18, %s3534_s19  ;;  %p3540_p10 = scmp.lt.s32.totalorder %s3534_s19, %s3534_s19 }
 0x178   :  { %v2260_v38 = vrot.slane %v2259_v34, 2  ;;  %v2273_v45 = vadd.f32 %v2272_v39, %v2271_v37  ;;  %v2286_v52 = vrot.slane %v2285_v49, 4  ;;  %v2292_v53 = vsel %vm2176_vm1, %v4207_v46, 0.0 }
 0x179   :  { %v2267_v41 = vrot.slane %v2266_v36, 2  ;;  %v2280_v48 = vadd.f32 %v2279_v42, %v2278_v40  ;;  %v2293_v56 = vrot.slane %v2292_v53, 4  ;;  %p3541_p11 = por %p3540_p10, %p3539_p9 }
 0x17a   :  { %v2261_v44 = vadd.f32 %v2260_v38, %v2259_v34  ;;  %v2274_v51 = vrot.slane %v2273_v45, 2  ;;  %v2287_v61 = vadd.f32 %v2286_v52, %v2285_v49 }
 0x17b   :  { %v2268_v47 = vadd.f32 %v2267_v41, %v2266_v36  ;;  %v2281_v55 = vrot.slane %v2280_v48, 2  ;;  %v2294_v63 = vadd.f32 %v2293_v56, %v2292_v53  ;;  %p3542_p12 = pnand %p3541_p11, %p3535_p8 }
 0x17c   :  { %v2262_v50 = vrot.slane %v2261_v44, 1  ;;  %v2275_v60 = vadd.f32 %v2274_v51, %v2273_v45  ;;  %v2288_v3 = vrot.slane %v2287_v61, 2 }
 0x17d   :  { %v2269_v54 = vrot.slane %v2268_v47, 1  ;;  %v2282_v59 = vadd.f32 %v2281_v55, %v2280_v48  ;;  %v2295_v8 = vrot.slane %v2294_v63, 2 }
 0x17e   :  { %v3493_v57 = vpop.eup %3492  ;;  %v2263_v58 = vadd.f32 %v2262_v50, %v2261_v44  ;;  %v2276_v1 = vrot.slane %v2275_v60, 1  ;;  %v2289_v10 = vadd.f32 %v2288_v3, %v2287_v61 }
 0x17f   :  { %v2270_v62 = vadd.f32 %v2269_v54, %v2268_v47  ;;  %v2299_v0 = vsel %vm2176_vm1, %v3493_v57, 0.0  ;;  %v2283_v7 = vrot.slane %v2282_v59, 1  ;;  %v2296_v13 = vadd.f32 %v2295_v8, %v2294_v63 }
 0x180   :  { %3496 = vrcp.f32 %v2263_v58  ;;  %v2300_v4 = vrot.slane %v2299_v0, 4  ;;  %v3495_v5 = vpop.eup %3494  ;;  %v2277_v9 = vadd.f32 %v2276_v1, %v2275_v60  ;;  %v2290_v6 = vrot.slane %v2289_v10, 1 }
 0x181   :  { %3498 = vrcp.f32 %v2270_v62  ;;  %v2306_v12 = vsel %vm2176_vm1, %v3495_v5, 0.0  ;;  %v2284_v2 = vadd.f32 %v2283_v7, %v2282_v59  ;;  %v2297_v17 = vrot.slane %v2296_v13, 1 }
 0x182   :  { %v2301_v11 = vadd.f32 %v2300_v4, %v2299_v0  ;;  %v2307_v14 = vrot.slane %v2306_v12, 4  ;;  %3500 = vrcp.f32 %v2277_v9  ;;  %v2291_v19 = vadd.f32 %v2290_v6, %v2289_v10 }
 0x183   :  { %3502 = vrcp.f32 %v2284_v2  ;;  %v2298_v22 = vadd.f32 %v2297_v17, %v2296_v13 }
 0x184   :  { %v2302_v15 = vrot.slane %v2301_v11, 2  ;;  %v2308_v18 = vadd.f32 %v2307_v14, %v2306_v12  ;;  %3504 = vrcp.f32 %v2291_v19 }
 0x185   :  { %3506 = vrcp.f32 %v2298_v22 }
 0x186   :  { %v2303_v20 = vadd.f32 %v2302_v15, %v2301_v11  ;;  %v2309_v23 = vrot.slane %v2308_v18, 2 }
 0x188   :  { %v2304_v24 = vrot.slane %v2303_v20, 1  ;;  %v2310_v16 = vadd.f32 %v2309_v23, %v2308_v18 }
 0x18a   :  { %v3497_v25 = vpop.eup %3496  ;;  %v2305_v27 = vadd.f32 %v2304_v24, %v2303_v20  ;;  %v2311_v29 = vrot.slane %v2310_v16, 1 }
 0x18b   :  { %v3499_v28 = vpop.eup %3498  ;;  %v2321_v30 = vmul.f32 %v3497_v25, %v4188_v21 }
 0x18c   :  { %3508 = vrcp.f32 %v2305_v27  ;;  %v2322_v31 = vmul.f32 %v3499_v28, %v4190_v26  ;;  %v2312_v32 = vadd.f32 %v2311_v29, %v2310_v16  ;;  %v3501_v34 = vpop.eup %3500 }
 0x18d   :  { %v3503_v37 = vpop.eup %3502  ;;  %v2323_v38 = vmul.f32 %v3501_v34, %v4197_v33 }
 0x18e   :  { %v2337_v36 = vcombine.low %v2321_v30, %v2322_v31  ;;  %3510 = vrcp.f32 %v2312_v32  ;;  %v2324_v39 = vmul.f32 %v3503_v37, %v4199_v35  ;;  %v3505_v40 = vpop.eup %3504 }
 0x18f   :  { %v3507_v42 = vpop.eup %3506  ;;  %v2325_v44 = vmul.f32 %v3505_v40, %v4205_v43 }
 0x190   :  { %2345 = vst [vmem:[#allocation4] sm:$0xff] %v2337_v36  ;;  %v2338_v41 = vcombine.low %v2323_v38, %v2324_v39  ;;  %v2326_v21 = vmul.f32 %v3507_v42, %v4207_v46 }
 0x192   :  { %2346 = vst [vmem:[#allocation4 + $0x8] sm:$0xff] %v2338_v41  ;;  %v2339_v26 = vcombine.low %v2325_v44, %v2326_v21 }
 0x194   :  { %2347 = vst [vmem:[#allocation4 + $0x10] sm:$0xff] %v2339_v26 }
 0x196   :  { %v3509_v45 = vpop.eup %3508 }
 0x197   :  { %v2327_v47 = vmul.f32 %v3509_v45, %v3493_v57 }
 0x198   :  { %v3511_v48 = vpop.eup %3510 }
 0x199   :  { %v2328_v49 = vmul.f32 %v3511_v48, %v3495_v5 }
 0x19b   :  { %v2340_v33 = vcombine.low %v2327_v47, %v2328_v49 }
 0x19d   :  { %2348 = vst [vmem:[#allocation4 + $0x18] sm:$0xff] %v2340_v33 }
 0x19e   :  { %3545 = shalt.err (!%p3542_p12)
}
 0x19f   :  { %s3546_s22 = scalar_lea.hbm %s4238_s5, 512 }
 0x1a0   :  { %p3547_p13 = scmp.ne.s32.totalorder %s4238_s5, %s3546_s22  ;;  %p3550_p0 = scmp.lt.u32.totalorder %s3546_s22, %s4238_s5 }
 0x1a2   :  { %p3552_p1 = pnand %p3550_p0, %p3547_p13 }
 0x1a4   :  { %3555 = shalt.err (!%p3552_p1)
}
 0x1a5   :  { %2370 = dma.vmem_to_hbm [thread:$0]  %s2368_s18, 512, %s4238_s5, [#allocation5]  }
 0x1a6   :  { %3556 = dma.done.wait [#allocation3], 8192  }
 0x1a7   :  { %3557 = vsyncadd [#allocation3], 4294959104 }
 0x1a8   :  { %3558 = dma.done.wait [#allocation5], 512  }
 0x1a9   :  { %3559 = vsyncadd [#allocation5], 4294966784 }
 0x1aa   :  { %2377 = vsyncpa [#allocation3], 1 }
 0x1ab   :  { %2378 = vsyncpa [#allocation5], 1 }

</bundles_post_ra>
